<compile_context>
chip_gen: v7x
topology: tpu7x:2x2x1
jax: 0.10.0
libtpu: 0.0.40
codegen_flags: <defaults>
</compile_context>

<pallas_src>
import math
import functools

import jax
import jax.numpy as jnp
from jax import lax
from jax.experimental import pallas as pl
from jax.experimental.pallas import tpu as pltpu


# ----------------------------------------------------------------------------
# Fused transformer stack + final norm + dmodel_mlp head  (one pallas_call)
# ----------------------------------------------------------------------------
def _stack_kernel(x_ref, mask_ref,
                  inw_ref, inb_ref, outw_ref, outb_ref,
                  ln1g_ref, ln1b_ref,
                  ff1w_ref, ff1b_ref, ff2w_ref, ff2b_ref,
                  ln2g_ref, ln2b_ref,
                  mlp1w_ref, mlp1b_ref, mlp2w_ref, mlp2b_ref,
                  o_ref, act_ref, *, nhead, d):
    l = pl.program_id(0)
    nlayers = pl.num_programs(0)
    hd = d // nhead
    scale = 1.0 / math.sqrt(hd)
    bf16 = jnp.bfloat16

    @pl.when(l == 0)
    def _():
        act_ref[...] = x_ref[...]

    x = act_ref[...]                                         # [M, d] f32

    def mm(a, w):                                            # bf16 MXU, f32 acc
        return jnp.dot(a.astype(bf16), w, preferred_element_type=jnp.float32)

    def ln(v, g, b, eps):
        mu = jnp.mean(v, axis=-1, keepdims=True)
        vc = v - mu
        var = jnp.mean(vc * vc, axis=-1, keepdims=True)
        y = vc * lax.rsqrt(var + eps)
        if g is not None:
            y = y * g + b
        return y

    # ---- multi-head self-attention: all samples at once per head, exact
    #      per-sample attention enforced by a block-diagonal [M, M] additive
    #      mask (0 inside sample, -1e30 across samples), fetched once.
    qkv = mm(x, inw_ref[...]) + inb_ref[...]                 # [M, 3d]
    mask = mask_ref[...]                                     # [M, M] f32
    heads = []
    for h in range(nhead):
        qh = qkv[:, h * hd:(h + 1) * hd] * scale             # pre-scale q
        kh = qkv[:, d + h * hd:d + (h + 1) * hd]
        vh = qkv[:, 2 * d + h * hd:2 * d + (h + 1) * hd]
        s = jnp.dot(qh, kh.T, preferred_element_type=jnp.float32) + mask
        s = s - jnp.max(s, axis=-1, keepdims=True)
        p = jnp.exp(s)
        p = p * pl.reciprocal(jnp.sum(p, axis=-1, keepdims=True), approx=True)
        heads.append(jnp.dot(p, vh, preferred_element_type=jnp.float32))
    attn = jnp.concatenate(heads, axis=-1)                   # [M, d]
    attn = mm(attn, outw_ref[...]) + outb_ref[...]

    x = ln(x + attn, ln1g_ref[...], ln1b_ref[...], 1e-5)     # post-norm

    # ---- feed-forward ----
    h1 = jnp.maximum(mm(x, ff1w_ref[...]) + ff1b_ref[...], 0.0)
    h2 = mm(h1, ff2w_ref[...]) + ff2b_ref[...]
    x = ln(x + h2, ln2g_ref[...], ln2b_ref[...], 1e-5)
    act_ref[...] = x                                         # stays in VMEM

    # ---- last layer: final non-affine LayerNorm (eps=1e-6) + dmodel_mlp ----
    @pl.when(l == nlayers - 1)
    def _():
        xn = ln(x, None, None, 1e-6)
        hh = jnp.dot(xn.astype(bf16), mlp1w_ref[...],
                     preferred_element_type=jnp.float32) + mlp1b_ref[...]
        hh = jnp.maximum(hh, 0.0)
        # N=1 projection as mul + lane reduction (no N=1 matmul).
        o = jnp.sum(hh * mlp2w_ref[...], axis=-1, keepdims=True) + mlp2b_ref[...]
        o_ref[...] = o


def transformer_stack_head(embd, params, cfg):
    """embd: [BB, n, d] -> logits [BB*n, 1]; whole stack in one pallas_call."""
    BB, n, d = embd.shape
    M = BB * n
    L, dh, nhead = cfg["nlayers"], cfg["d_hid"], cfg["nhead"]
    enc = params["enc"]
    bf16, f32 = jnp.bfloat16, jnp.float32

    # Block-diagonal additive attention mask (exact per-sample attention after
    # flattening [BB, n, d] -> [M, d]); computed once, DMA'd once.
    sample_id = jnp.arange(M, dtype=jnp.int32) // n
    mask = jnp.where(sample_id[:, None] == sample_id[None, :], 0.0, -1e30)
    mask = mask.astype(f32)

    def wspec(shape):            # per-layer weight: squeeze the layer axis
        return pl.BlockSpec((None,) + shape, lambda l: (l, 0, 0))

    def cspec(shape):            # layer-invariant input (fetched once)
        return pl.BlockSpec(shape, lambda l: (0, 0))

    kernel = functools.partial(_stack_kernel, nhead=nhead, d=d)
    out = pl.pallas_call(
        kernel,
        out_shape=jax.ShapeDtypeStruct((M, 1), f32),
        grid=(L,),
        in_specs=[
            cspec((M, d)),                                    # x (resident)
            cspec((M, M)),                                    # block-diag mask
            wspec((d, 3 * d)), wspec((1, 3 * d)),             # in_proj w,b
            wspec((d, d)), wspec((1, d)),                     # out_proj w,b
            wspec((1, d)), wspec((1, d)),                     # ln1 g,b
            wspec((d, dh)), wspec((1, dh)),                   # ff1 w,b
            wspec((dh, d)), wspec((1, d)),                    # ff2 w,b
            wspec((1, d)), wspec((1, d)),                     # ln2 g,b
            cspec((d, dh)),                                   # head mlp1 w
            cspec((1, dh)),                                   # head mlp1 b
            cspec((1, dh)),                                   # head mlp2 w (row)
            cspec((1, 1)),                                    # head mlp2 b
        ],
        out_specs=pl.BlockSpec((M, 1), lambda l: (0, 0)),
        scratch_shapes=[pltpu.VMEM((M, d), f32)],
        compiler_params=pltpu.CompilerParams(
            dimension_semantics=("arbitrary",)),              # layers are sequential
        # TODO(synk): for v7x (2 TCs) add a 'parallel' grid axis over b*beam once
        # shapes are large enough that splitting beats the extra grid steps.
    )(
        embd.reshape(M, d).astype(f32),
        mask,
        enc["inw"].astype(bf16), enc["inb"].astype(f32),
        enc["outw"].astype(bf16), enc["outb"].astype(f32),
        enc["ln1g"].astype(f32), enc["ln1b"].astype(f32),
        enc["ff1w"].astype(bf16), enc["ff1b"].astype(f32),
        enc["ff2w"].astype(bf16), enc["ff2b"].astype(f32),
        enc["ln2g"].astype(f32), enc["ln2b"].astype(f32),
        params["dmodel_mlp1_w"].astype(bf16),
        params["dmodel_mlp1_b"].reshape(1, dh).astype(f32),
        params["dmodel_mlp2_w"].reshape(1, dh).astype(f32),
        params["dmodel_mlp2_b"].reshape(1, 1).astype(f32),
    )
    return out


# ----------------------------------------------------------------------------
# Fused 2-layer MLP kernel (used for the CNN MLP and the time MLP)
# ----------------------------------------------------------------------------
def _mlp2_kernel(x_ref, w1_ref, b1_ref, w2_ref, b2_ref, o_ref, *, act1):
    h = jnp.dot(x_ref[...].astype(jnp.bfloat16), w1_ref[...],
                preferred_element_type=jnp.float32) + b1_ref[...]
    if act1 == "relu":
        h = jnp.maximum(h, 0.0)
    elif act1 == "silu":
        h = h * jax.nn.sigmoid(h)
    y = jnp.dot(h.astype(jnp.bfloat16), w2_ref[...],
                preferred_element_type=jnp.float32) + b2_ref[...]
    o_ref[...] = y.astype(o_ref.dtype)


def fused_mlp(x, w1, b1, w2, b2, act1="relu"):
    """y = (act1(x @ w1 + b1)) @ w2 + b2 in one kernel; full-array blocks."""
    M, K = x.shape
    H = w1.shape[1]
    N = w2.shape[1]
    return pl.pallas_call(
        functools.partial(_mlp2_kernel, act1=act1),
        out_shape=jax.ShapeDtypeStruct((M, N), jnp.float32),
        grid=(1,),
        in_specs=[
            pl.BlockSpec((M, K), lambda i: (0, 0)),
            pl.BlockSpec((K, H), lambda i: (0, 0)),
            pl.BlockSpec((1, H), lambda i: (0, 0)),
            pl.BlockSpec((H, N), lambda i: (0, 0)),
            pl.BlockSpec((1, N), lambda i: (0, 0)),
        ],
        out_specs=pl.BlockSpec((M, N), lambda i: (0, 0)),
    )(x.astype(jnp.float32),
      w1.astype(jnp.bfloat16), b1.reshape(1, H).astype(jnp.float32),
      w2.astype(jnp.bfloat16), b2.reshape(1, N).astype(jnp.float32))


# ----------------------------------------------------------------------------
# Model glue (plain JAX / XLA for tiny ops, Pallas for the hot paths)
# ----------------------------------------------------------------------------
def positional_encoding(max_len, d_model):
    position = jnp.arange(max_len, dtype=jnp.float32)[:, None]
    div_term = jnp.exp(jnp.arange(0, d_model, 2, dtype=jnp.float32)
                       * (-math.log(10000.0) / d_model))
    pe = jnp.zeros((max_len, d_model), jnp.float32)
    pe = pe.at[:, 0::2].set(jnp.sin(position * div_term))
    pe = pe.at[:, 1::2].set(jnp.cos(position * div_term))
    return pe


def timestep_embedding(t, dim, max_period=10000):
    half = dim // 2
    freqs = jnp.exp(-math.log(max_period)
                    * jnp.arange(half, dtype=jnp.float32) / half)
    args = t[:, None].astype(jnp.float32) * freqs[None]
    return jnp.concatenate([jnp.cos(args), jnp.sin(args)], axis=-1)


def time_embed(t, p):
    e = timestep_embedding(t, 256)
    return fused_mlp(e, p["time_mlp1_w"], p["time_mlp1_b"],
                     p["time_mlp2_w"], p["time_mlp2_b"], act1="silu")


def unscramble_cnn(x_start, p, cfg):
    """UnscrambleMnistCNN.forward (eval): [b, n, c, h, w] -> [b, n, d_model].
    Conv+BN+ReLU+MaxPool left to XLA (tiny); the MLP is one fused Pallas call."""
    b, nseq, c, H, W = x_start.shape
    hc1 = cfg["hidden_channels1"]
    k, s, pad = cfg["kernel_size1"], cfg["stride1"], cfg["padding1"]

    x = x_start.reshape(b * nseq, c, H, W).astype(jnp.float32)
    # Fold eval-mode BatchNorm2d into the conv weights/bias.
    scale = p["bn_gamma"] / jnp.sqrt(p["bn_var"] + 1e-5)
    w_eff = p["conv_w"] * scale[:, None, None, None]
    b_eff = p["conv_b"] * scale + (p["bn_beta"] - p["bn_mean"] * scale)
    y = lax.conv_general_dilated(x, w_eff, window_strides=(s, s),
                                 padding=[(pad, pad), (pad, pad)],
                                 dimension_numbers=("NCHW", "OIHW", "NCHW"))
    y = jnp.maximum(y + b_eff[None, :, None, None], 0.0)
    bn, _, oh, ow = y.shape
    y = y.reshape(bn, hc1, oh // 2, 2, ow // 2, 2).max(axis=(3, 5))  # MaxPool2d(2)
    flat = y.reshape(bn, -1)                                         # (C,H,W) flatten

    out = fused_mlp(flat, p["cnn_mlp1_w"], p["cnn_mlp1_b"],
                    p["cnn_mlp2_w"], p["cnn_mlp2_b"], act1="relu")
    return out.reshape(b, nseq, cfg["d_model"])


def reverse_diffusion_forward(params, cfg, src, time, x_start):
    """Eval-mode ReverseDiffusion.forward.
       src: [b, beam, n] int permutations; time: [b]; x_start: [b, n, c, h, w]."""
    b, beam, nseq = src.shape
    d = cfg["d_model"]

    # time.unsqueeze(-1).expand(batch_shape).flatten()
    time_flat = jnp.broadcast_to(time[:, None], (b, beam)).reshape(-1)

    # eval_patch_embd: CNN embedding, unsqueeze beam dim, permute, flatten
    patch = unscramble_cnn(x_start, params, cfg)                 # [b, n, d]
    patch = jnp.broadcast_to(patch[:, None], (b, beam, nseq, d))
    # TODO(synk): utils.permute_embd not provided; assumed to be a gather of the
    # piece embeddings by the permutation indices.
    src_g = jnp.take_along_axis(patch, src[..., None].astype(jnp.int32), axis=2)
    embd = src_g.reshape(b * beam, nseq, d)

    t_emb = time_embed(time_flat, params)                        # [b*beam, d]

    # PositionalEncoding + time-embedding add (cheap XLA elementwise), then the
    # whole encoder stack + final norm + dmodel_mlp head in a single kernel.
    pe = positional_encoding(nseq, d)
    embd = embd + pe[None, :, :] + t_emb[:, None, :]
    out = transformer_stack_head(embd, params, cfg)              # [b*beam*n, 1]
    return out.reshape(b, beam, nseq)


# ----------------------------------------------------------------------------
# Deterministic parameter init (per-layer weights pre-stacked on a layer axis)
# ----------------------------------------------------------------------------
def init_params(key, cfg):
    d, d_hid, L = cfg["d_model"], cfg["d_hid"], cfg["nlayers"]
    hc1, c, k = cfg["hidden_channels1"], cfg["in_channels"], cfg["kernel_size1"]
    piece = cfg["image_size"] // cfg["num_pieces"]
    dim_after_conv = (piece // 2) ** 2 * hc1
    mlp_hid = (dim_after_conv + d) // 2

    keys = iter(jax.random.split(key, 40))

    def w(shape, s=0.05):
        return jax.random.normal(next(keys), shape, jnp.float32) * s

    p = {
        "conv_w": w((hc1, c, k, k), 0.2), "conv_b": w((hc1,), 0.1),
        "bn_gamma": 1.0 + w((hc1,), 0.1), "bn_beta": w((hc1,), 0.1),
        "bn_mean": jnp.zeros((hc1,), jnp.float32),
        "bn_var": jnp.ones((hc1,), jnp.float32),
        "cnn_mlp1_w": w((dim_after_conv, mlp_hid)), "cnn_mlp1_b": w((mlp_hid,), 0.01),
        "cnn_mlp2_w": w((mlp_hid, d)), "cnn_mlp2_b": w((d,), 0.01),
        "time_mlp1_w": w((256, d)), "time_mlp1_b": w((d,), 0.01),
        "time_mlp2_w": w((d, d)), "time_mlp2_b": w((d,), 0.01),
        "dmodel_mlp1_w": w((d, d_hid)), "dmodel_mlp1_b": w((d_hid,), 0.01),
        "dmodel_mlp2_w": w((d_hid, 1)), "dmodel_mlp2_b": w((1,), 0.01),
        "enc": {
            "inw": w((L, d, 3 * d)), "inb": w((L, 1, 3 * d), 0.01),
            "outw": w((L, d, d)), "outb": w((L, 1, d), 0.01),
            "ln1g": jnp.ones((L, 1, d), jnp.float32),
            "ln1b": jnp.zeros((L, 1, d), jnp.float32),
            "ff1w": w((L, d, d_hid)), "ff1b": w((L, 1, d_hid), 0.01),
            "ff2w": w((L, d_hid, d)), "ff2b": w((L, 1, d), 0.01),
            "ln2g": jnp.ones((L, 1, d), jnp.float32),
            "ln2b": jnp.zeros((L, 1, d), jnp.float32),
        },
    }
    return p


# ----------------------------------------------------------------------------
if __name__ == "__main__":
    cfg = dict(
        dataset="unscramble-MNIST", in_channels=1, num_pieces=2, image_size=16,
        hidden_channels1=8, kernel_size1=3, stride1=1, padding1=1,
        d_model=32, nhead=4, d_hid=64, nlayers=2, d_out_adjust="0",
    )
    key = jax.random.PRNGKey(0)
    kp, k_src, k_x = jax.random.split(key, 3)
    params = init_params(kp, cfg)

    b, beam = 2, 2
    nseq = cfg["num_pieces"] ** 2
    piece = cfg["image_size"] // cfg["num_pieces"]

    src = jnp.stack([
        jnp.stack([jax.random.permutation(jax.random.fold_in(k_src, i * beam + j), nseq)
                   for j in range(beam)])
        for i in range(b)
    ]).astype(jnp.int32)                                              # [2, 2, 4]
    time = jnp.array([3.0, 7.0], jnp.float32)                         # [2]
    x_start = jax.random.normal(k_x, (b, nseq, cfg["in_channels"], piece, piece),
                                jnp.float32)                          # [2, 4, 1, 8, 8]

    fwd = jax.jit(lambda p, s, t, x: reverse_diffusion_forward(p, cfg, s, t, x))
    out = jax.block_until_ready(fwd(params, src, time, x_start))
    assert out.shape == (b, beam, nseq), out.shape
    assert bool(jnp.all(jnp.isfinite(out)))
    print("KERNEL_OK")
</pallas_src>

<mosaic_0001>
module attributes {stable_mosaic.version = 11 : i64} {
  func.func @_mlp2_kernel(%arg0: i32, %arg1: memref<8x128xf32, #tpu.memory_space<vmem>>, %arg2: memref<128x80xbf16, #tpu.memory_space<vmem>>, %arg3: memref<1x80xf32, #tpu.memory_space<vmem>>, %arg4: memref<80x32xbf16, #tpu.memory_space<vmem>>, %arg5: memref<1x32xf32, #tpu.memory_space<vmem>>, %arg6: memref<8x32xf32, #tpu.memory_space<vmem>>) attributes {dimension_semantics = [#tpu.dimension_semantics<arbitrary>], iteration_bounds = array<i64: 1>, scalar_prefetch = 0 : i64, scratch_operands = 0 : i64, tpu.core_type = #tpu.core_type<tc>, window_params = [{pipeline_mode = #tpu.pipeline_mode<synchronous>, transform_indices = @transform_0, window_bounds = array<i64: 8, 128>}, {pipeline_mode = #tpu.pipeline_mode<synchronous>, transform_indices = @transform_1, window_bounds = array<i64: 128, 80>}, {pipeline_mode = #tpu.pipeline_mode<synchronous>, transform_indices = @transform_2, window_bounds = array<i64: 1, 80>}, {pipeline_mode = #tpu.pipeline_mode<synchronous>, transform_indices = @transform_3, window_bounds = array<i64: 80, 32>}, {pipeline_mode = #tpu.pipeline_mode<synchronous>, transform_indices = @transform_4, window_bounds = array<i64: 1, 32>}, {pipeline_mode = #tpu.pipeline_mode<synchronous>, transform_indices = @transform_5, window_bounds = array<i64: 8, 32>}]} {
    %c0 = arith.constant 0 : index
    %c0_0 = arith.constant 0 : index
    %0 = vector.load %arg1[%c0, %c0_0] : memref<8x128xf32, #tpu.memory_space<vmem>>, vector<8x128xf32>
    %1 = arith.truncf %0 : vector<8x128xf32> to vector<8x128xbf16>
    %c0_1 = arith.constant 0 : index
    %c0_2 = arith.constant 0 : index
    %2 = vector.load %arg2[%c0_1, %c0_2] : memref<128x80xbf16, #tpu.memory_space<vmem>>, vector<128x80xbf16>
    %cst = arith.constant dense<0.000000e+00> : vector<8x80xf32>
    %3 = tpu.matmul %1, %2, %cst {dimension_numbers = #tpu.dot_dimension_numbers<[1], [0], [0], [1], [0, 0, 1, 1], [], []>} : vector<8x128xbf16>, vector<128x80xbf16>, vector<8x80xf32> -> vector<8x80xf32>
    %c0_3 = arith.constant 0 : index
    %c0_4 = arith.constant 0 : index
    %4 = vector.load %arg3[%c0_3, %c0_4] : memref<1x80xf32, #tpu.memory_space<vmem>>, vector<1x80xf32>
    %5 = vector.broadcast %4 : vector<1x80xf32> to vector<8x80xf32>
    %6 = arith.addf %3, %5 : vector<8x80xf32>
    %cst_5 = arith.constant 0.000000e+00 : f32
    %7 = vector.broadcast %cst_5 : f32 to vector<8x80xf32>
    %8 = arith.maximumf %6, %7 : vector<8x80xf32>
    %9 = arith.truncf %8 : vector<8x80xf32> to vector<8x80xbf16>
    %c0_6 = arith.constant 0 : index
    %c0_7 = arith.constant 0 : index
    %10 = vector.load %arg4[%c0_6, %c0_7] : memref<80x32xbf16, #tpu.memory_space<vmem>>, vector<80x32xbf16>
    %cst_8 = arith.constant dense<0.000000e+00> : vector<8x32xf32>
    %11 = tpu.matmul %9, %10, %cst_8 {dimension_numbers = #tpu.dot_dimension_numbers<[1], [0], [0], [1], [0, 0, 1, 1], [], []>} : vector<8x80xbf16>, vector<80x32xbf16>, vector<8x32xf32> -> vector<8x32xf32>
    %c0_9 = arith.constant 0 : index
    %c0_10 = arith.constant 0 : index
    %12 = vector.load %arg5[%c0_9, %c0_10] : memref<1x32xf32, #tpu.memory_space<vmem>>, vector<1x32xf32>
    %13 = vector.broadcast %12 : vector<1x32xf32> to vector<8x32xf32>
    %14 = arith.addf %11, %13 : vector<8x32xf32>
    %c0_11 = arith.constant 0 : index
    %c0_12 = arith.constant 0 : index
    %15 = vector.load %arg6[%c0_11, %c0_12] : memref<8x32xf32, #tpu.memory_space<vmem>>, vector<8x32xf32>
    tpu.vector_store %arg6[%c0_11, %c0_12], %14 {strides = array<i32>} : memref<8x32xf32, #tpu.memory_space<vmem>>, vector<8x32xf32>,
    return
  }
  func.func @transform_0(%arg0: i32) -> (i32, i32) {
    %c0_i32 = arith.constant 0 : i32
    %c0_i32_0 = arith.constant 0 : i32
    %c0_i32_1 = arith.constant 0 : i32
    return %c0_i32, %c0_i32_0 : i32, i32
  }
  func.func @transform_1(%arg0: i32) -> (i32, i32) {
    %c0_i32 = arith.constant 0 : i32
    %c0_i32_0 = arith.constant 0 : i32
    %c0_i32_1 = arith.constant 0 : i32
    return %c0_i32, %c0_i32_0 : i32, i32
  }
  func.func @transform_2(%arg0: i32) -> (i32, i32) {
    %c0_i32 = arith.constant 0 : i32
    %c0_i32_0 = arith.constant 0 : i32
    %c0_i32_1 = arith.constant 0 : i32
    return %c0_i32, %c0_i32_0 : i32, i32
  }
  func.func @transform_3(%arg0: i32) -> (i32, i32) {
    %c0_i32 = arith.constant 0 : i32
    %c0_i32_0 = arith.constant 0 : i32
    %c0_i32_1 = arith.constant 0 : i32
    return %c0_i32, %c0_i32_0 : i32, i32
  }
  func.func @transform_4(%arg0: i32) -> (i32, i32) {
    %c0_i32 = arith.constant 0 : i32
    %c0_i32_0 = arith.constant 0 : i32
    %c0_i32_1 = arith.constant 0 : i32
    return %c0_i32, %c0_i32_0 : i32, i32
  }
  func.func @transform_5(%arg0: i32) -> (i32, i32) {
    %c0_i32 = arith.constant 0 : i32
    %c0_i32_0 = arith.constant 0 : i32
    %c0_i32_1 = arith.constant 0 : i32
    return %c0_i32, %c0_i32_0 : i32, i32
  }
}

module attributes {stable_mosaic.version = 11 : i64} {
  func.func @_mlp2_kernel(%arg0: i32, %arg1: memref<4x256xf32, #tpu.memory_space<vmem>>, %arg2: memref<256x32xbf16, #tpu.memory_space<vmem>>, %arg3: memref<1x32xf32, #tpu.memory_space<vmem>>, %arg4: memref<32x32xbf16, #tpu.memory_space<vmem>>, %arg5: memref<1x32xf32, #tpu.memory_space<vmem>>, %arg6: memref<4x32xf32, #tpu.memory_space<vmem>>) attributes {dimension_semantics = [#tpu.dimension_semantics<arbitrary>], iteration_bounds = array<i64: 1>, scalar_prefetch = 0 : i64, scratch_operands = 0 : i64, tpu.core_type = #tpu.core_type<tc>, window_params = [{pipeline_mode = #tpu.pipeline_mode<synchronous>, transform_indices = @transform_0, window_bounds = array<i64: 4, 256>}, {pipeline_mode = #tpu.pipeline_mode<synchronous>, transform_indices = @transform_1, window_bounds = array<i64: 256, 32>}, {pipeline_mode = #tpu.pipeline_mode<synchronous>, transform_indices = @transform_2, window_bounds = array<i64: 1, 32>}, {pipeline_mode = #tpu.pipeline_mode<synchronous>, transform_indices = @transform_3, window_bounds = array<i64: 32, 32>}, {pipeline_mode = #tpu.pipeline_mode<synchronous>, transform_indices = @transform_4, window_bounds = array<i64: 1, 32>}, {pipeline_mode = #tpu.pipeline_mode<synchronous>, transform_indices = @transform_5, window_bounds = array<i64: 4, 32>}]} {
    %c0 = arith.constant 0 : index
    %c0_0 = arith.constant 0 : index
    %0 = vector.load %arg1[%c0, %c0_0] : memref<4x256xf32, #tpu.memory_space<vmem>>, vector<4x256xf32>
    %1 = arith.truncf %0 : vector<4x256xf32> to vector<4x256xbf16>
    %c0_1 = arith.constant 0 : index
    %c0_2 = arith.constant 0 : index
    %2 = vector.load %arg2[%c0_1, %c0_2] : memref<256x32xbf16, #tpu.memory_space<vmem>>, vector<256x32xbf16>
    %cst = arith.constant dense<0.000000e+00> : vector<4x32xf32>
    %3 = tpu.matmul %1, %2, %cst {dimension_numbers = #tpu.dot_dimension_numbers<[1], [0], [0], [1], [0, 0, 1, 1], [], []>} : vector<4x256xbf16>, vector<256x32xbf16>, vector<4x32xf32> -> vector<4x32xf32>
    %c0_3 = arith.constant 0 : index
    %c0_4 = arith.constant 0 : index
    %4 = vector.load %arg3[%c0_3, %c0_4] : memref<1x32xf32, #tpu.memory_space<vmem>>, vector<1x32xf32>
    %5 = vector.broadcast %4 : vector<1x32xf32> to vector<4x32xf32>
    %6 = arith.addf %3, %5 : vector<4x32xf32>
    %7 = arith.negf %6 : vector<4x32xf32>
    %8 = math.exp %7 : vector<4x32xf32>
    %cst_5 = arith.constant 1.000000e+00 : f32
    %9 = vector.broadcast %cst_5 : f32 to vector<4x32xf32>
    %10 = arith.addf %9, %8 : vector<4x32xf32>
    %11 = arith.divf %9, %10 : vector<4x32xf32>
    %12 = arith.mulf %6, %11 : vector<4x32xf32>
    %13 = arith.truncf %12 : vector<4x32xf32> to vector<4x32xbf16>
    %c0_6 = arith.constant 0 : index
    %c0_7 = arith.constant 0 : index
    %14 = vector.load %arg4[%c0_6, %c0_7] : memref<32x32xbf16, #tpu.memory_space<vmem>>, vector<32x32xbf16>
    %cst_8 = arith.constant dense<0.000000e+00> : vector<4x32xf32>
    %15 = tpu.matmul %13, %14, %cst_8 {dimension_numbers = #tpu.dot_dimension_numbers<[1], [0], [0], [1], [0, 0, 1, 1], [], []>} : vector<4x32xbf16>, vector<32x32xbf16>, vector<4x32xf32> -> vector<4x32xf32>
    %c0_9 = arith.constant 0 : index
    %c0_10 = arith.constant 0 : index
    %16 = vector.load %arg5[%c0_9, %c0_10] : memref<1x32xf32, #tpu.memory_space<vmem>>, vector<1x32xf32>
    %17 = vector.broadcast %16 : vector<1x32xf32> to vector<4x32xf32>
    %18 = arith.addf %15, %17 : vector<4x32xf32>
    %c0_11 = arith.constant 0 : index
    %c0_12 = arith.constant 0 : index
    %19 = vector.load %arg6[%c0_11, %c0_12] : memref<4x32xf32, #tpu.memory_space<vmem>>, vector<4x32xf32>
    tpu.vector_store %arg6[%c0_11, %c0_12], %18 {strides = array<i32>} : memref<4x32xf32, #tpu.memory_space<vmem>>, vector<4x32xf32>,
    return
  }
  func.func @transform_0(%arg0: i32) -> (i32, i32) {
    %c0_i32 = arith.constant 0 : i32
    %c0_i32_0 = arith.constant 0 : i32
    %c0_i32_1 = arith.constant 0 : i32
    return %c0_i32, %c0_i32_0 : i32, i32
  }
  func.func @transform_1(%arg0: i32) -> (i32, i32) {
    %c0_i32 = arith.constant 0 : i32
    %c0_i32_0 = arith.constant 0 : i32
    %c0_i32_1 = arith.constant 0 : i32
    return %c0_i32, %c0_i32_0 : i32, i32
  }
  func.func @transform_2(%arg0: i32) -> (i32, i32) {
    %c0_i32 = arith.constant 0 : i32
    %c0_i32_0 = arith.constant 0 : i32
    %c0_i32_1 = arith.constant 0 : i32
    return %c0_i32, %c0_i32_0 : i32, i32
  }
  func.func @transform_3(%arg0: i32) -> (i32, i32) {
    %c0_i32 = arith.constant 0 : i32
    %c0_i32_0 = arith.constant 0 : i32
    %c0_i32_1 = arith.constant 0 : i32
    return %c0_i32, %c0_i32_0 : i32, i32
  }
  func.func @transform_4(%arg0: i32) -> (i32, i32) {
    %c0_i32 = arith.constant 0 : i32
    %c0_i32_0 = arith.constant 0 : i32
    %c0_i32_1 = arith.constant 0 : i32
    return %c0_i32, %c0_i32_0 : i32, i32
  }
  func.func @transform_5(%arg0: i32) -> (i32, i32) {
    %c0_i32 = arith.constant 0 : i32
    %c0_i32_0 = arith.constant 0 : i32
    %c0_i32_1 = arith.constant 0 : i32
    return %c0_i32, %c0_i32_0 : i32, i32
  }
}

module attributes {stable_mosaic.version = 11 : i64} {
  func.func @_stack_kernel(%arg0: i32, %arg1: memref<16x32xf32, #tpu.memory_space<vmem>>, %arg2: memref<16x16xf32, #tpu.memory_space<vmem>>, %arg3: memref<1x32x96xbf16, #tpu.memory_space<vmem>>, %arg4: memref<1x1x96xf32, #tpu.memory_space<vmem>>, %arg5: memref<1x32x32xbf16, #tpu.memory_space<vmem>>, %arg6: memref<1x1x32xf32, #tpu.memory_space<vmem>>, %arg7: memref<1x1x32xf32, #tpu.memory_space<vmem>>, %arg8: memref<1x1x32xf32, #tpu.memory_space<vmem>>, %arg9: memref<1x32x64xbf16, #tpu.memory_space<vmem>>, %arg10: memref<1x1x64xf32, #tpu.memory_space<vmem>>, %arg11: memref<1x64x32xbf16, #tpu.memory_space<vmem>>, %arg12: memref<1x1x32xf32, #tpu.memory_space<vmem>>, %arg13: memref<1x1x32xf32, #tpu.memory_space<vmem>>, %arg14: memref<1x1x32xf32, #tpu.memory_space<vmem>>, %arg15: memref<32x64xbf16, #tpu.memory_space<vmem>>, %arg16: memref<1x64xf32, #tpu.memory_space<vmem>>, %arg17: memref<1x64xf32, #tpu.memory_space<vmem>>, %arg18: memref<1x1xf32, #tpu.memory_space<vmem>>, %arg19: memref<16x1xf32, #tpu.memory_space<vmem>>, %arg20: memref<16x32xf32, #tpu.memory_space<vmem>>) attributes {dimension_semantics = [#tpu.dimension_semantics<arbitrary>], iteration_bounds = array<i64: 2>, scalar_prefetch = 0 : i64, scratch_operands = 1 : i64, tpu.core_type = #tpu.core_type<tc>, window_params = [{pipeline_mode = #tpu.pipeline_mode<synchronous>, transform_indices = @transform_0, window_bounds = array<i64: 16, 32>}, {pipeline_mode = #tpu.pipeline_mode<synchronous>, transform_indices = @transform_1, window_bounds = array<i64: 16, 16>}, {transform_indices = @transform_2, window_bounds = array<i64: 1, 32, 96>}, {transform_indices = @transform_3, window_bounds = array<i64: 1, 1, 96>}, {transform_indices = @transform_4, window_bounds = array<i64: 1, 32, 32>}, {transform_indices = @transform_5, window_bounds = array<i64: 1, 1, 32>}, {transform_indices = @transform_6, window_bounds = array<i64: 1, 1, 32>}, {transform_indices = @transform_7, window_bounds = array<i64: 1, 1, 32>}, {transform_indices = @transform_8, window_bounds = array<i64: 1, 32, 64>}, {transform_indices = @transform_9, window_bounds = array<i64: 1, 1, 64>}, {transform_indices = @transform_10, window_bounds = array<i64: 1, 64, 32>}, {transform_indices = @transform_11, window_bounds = array<i64: 1, 1, 32>}, {transform_indices = @transform_12, window_bounds = array<i64: 1, 1, 32>}, {transform_indices = @transform_13, window_bounds = array<i64: 1, 1, 32>}, {pipeline_mode = #tpu.pipeline_mode<synchronous>, transform_indices = @transform_14, window_bounds = array<i64: 32, 64>}, {pipeline_mode = #tpu.pipeline_mode<synchronous>, transform_indices = @transform_15, window_bounds = array<i64: 1, 64>}, {pipeline_mode = #tpu.pipeline_mode<synchronous>, transform_indices = @transform_16, window_bounds = array<i64: 1, 64>}, {pipeline_mode = #tpu.pipeline_mode<synchronous>, transform_indices = @transform_17, window_bounds = array<i64: 1, 1>}, {pipeline_mode = #tpu.pipeline_mode<synchronous>, transform_indices = @transform_18, window_bounds = array<i64: 16, 1>}]} {
    %c0_i32 = arith.constant 0 : i32
    %0 = arith.cmpi eq, %arg0, %c0_i32 : i32
    %1 = arith.extui %0 : i1 to i32
    %c0_i32_0 = arith.constant 0 : i32
    %2 = arith.cmpi ne, %1, %c0_i32_0 : i32
    scf.if %2 {
      %c0_77 = arith.constant 0 : index
      %c0_78 = arith.constant 0 : index
      %170 = vector.load %arg1[%c0_77, %c0_78] : memref<16x32xf32, #tpu.memory_space<vmem>>, vector<16x32xf32>
      %c0_79 = arith.constant 0 : index
      %c0_80 = arith.constant 0 : index
      %171 = vector.load %arg20[%c0_79, %c0_80] : memref<16x32xf32, #tpu.memory_space<vmem>>, vector<16x32xf32>
      tpu.vector_store %arg20[%c0_79, %c0_80], %170 {strides = array<i32>} : memref<16x32xf32, #tpu.memory_space<vmem>>, vector<16x32xf32>,
    } else {
    }
    %c0 = arith.constant 0 : index
    %c0_1 = arith.constant 0 : index
    %3 = vector.load %arg20[%c0, %c0_1] : memref<16x32xf32, #tpu.memory_space<vmem>>, vector<16x32xf32>
    %c0_2 = arith.constant 0 : index
    %c0_3 = arith.constant 0 : index
    %c0_4 = arith.constant 0 : index
    %4 = vector.load %arg3[%c0_2, %c0_3, %c0_4] : memref<1x32x96xbf16, #tpu.memory_space<vmem>>, vector<1x32x96xbf16>
    %5 = vector.shape_cast %4 : vector<1x32x96xbf16> to vector<32x96xbf16>
    %6 = arith.truncf %3 : vector<16x32xf32> to vector<16x32xbf16>
    %cst = arith.constant dense<0.000000e+00> : vector<16x96xf32>
    %7 = tpu.matmul %6, %5, %cst {dimension_numbers = #tpu.dot_dimension_numbers<[1], [0], [0], [1], [0, 0, 1, 1], [], []>} : vector<16x32xbf16>, vector<32x96xbf16>, vector<16x96xf32> -> vector<16x96xf32>
    %c0_5 = arith.constant 0 : index
    %c0_6 = arith.constant 0 : index
    %c0_7 = arith.constant 0 : index
    %8 = vector.load %arg4[%c0_5, %c0_6, %c0_7] : memref<1x1x96xf32, #tpu.memory_space<vmem>>, vector<1x1x96xf32>
    %9 = vector.shape_cast %8 : vector<1x1x96xf32> to vector<1x96xf32>
    %10 = vector.broadcast %9 : vector<1x96xf32> to vector<16x96xf32>
    %11 = arith.addf %7, %10 : vector<16x96xf32>
    %c0_8 = arith.constant 0 : index
    %c0_9 = arith.constant 0 : index
    %12 = vector.load %arg2[%c0_8, %c0_9] : memref<16x16xf32, #tpu.memory_space<vmem>>, vector<16x16xf32>
    %13 = vector.extract_strided_slice %11 {offsets = [0, 0], sizes = [16, 8], strides = [1, 1]} : vector<16x96xf32> to vector<16x8xf32>
    %cst_10 = arith.constant 0.353553385 : f32
    %14 = vector.broadcast %cst_10 : f32 to vector<16x8xf32>
    %15 = arith.mulf %13, %14 : vector<16x8xf32>
    %16 = vector.extract_strided_slice %11 {offsets = [0, 32], sizes = [16, 8], strides = [1, 1]} : vector<16x96xf32> to vector<16x8xf32>
    %17 = vector.extract_strided_slice %11 {offsets = [0, 64], sizes = [16, 8], strides = [1, 1]} : vector<16x96xf32> to vector<16x8xf32>
    %18 = tpu.transpose %16, [1, 0] : vector<16x8xf32> -> vector<8x16xf32>
    %cst_11 = arith.constant dense<0.000000e+00> : vector<16x16xf32>
    %19 = tpu.matmul %15, %18, %cst_11 {dimension_numbers = #tpu.dot_dimension_numbers<[1], [0], [0], [1], [0, 0, 1, 1], [], []>} : vector<16x8xf32>, vector<8x16xf32>, vector<16x16xf32> -> vector<16x16xf32>
    %20 = arith.addf %19, %12 : vector<16x16xf32>
    %cst_12 = arith.constant dense<0xFF800000> : vector<16xf32>
    %21 = vector.multi_reduction <maximumf>, %20, %cst_12 [1] : vector<16x16xf32> to vector<16xf32>
    %22 = vector.shape_cast %21 : vector<16xf32> to vector<16x1xf32>
    %23 = vector.broadcast %22 : vector<16x1xf32> to vector<16x16xf32>
    %24 = arith.subf %20, %23 : vector<16x16xf32>
    %25 = math.exp %24 : vector<16x16xf32>
    %cst_13 = arith.constant dense<0.000000e+00> : vector<16xf32>
    %26 = vector.multi_reduction <add>, %25, %cst_13 [1] : vector<16x16xf32> to vector<16xf32>
    %27 = vector.shape_cast %26 : vector<16xf32> to vector<16x1xf32>
    %28 = tpu.reciprocal %27 {approx = true} : vector<16x1xf32> -> vector<16x1xf32>
    %29 = vector.broadcast %28 : vector<16x1xf32> to vector<16x16xf32>
    %30 = arith.mulf %25, %29 : vector<16x16xf32>
    %cst_14 = arith.constant dense<0.000000e+00> : vector<16x8xf32>
    %31 = tpu.matmul %30, %17, %cst_14 {dimension_numbers = #tpu.dot_dimension_numbers<[1], [0], [0], [1], [0, 0, 1, 1], [], []>} : vector<16x16xf32>, vector<16x8xf32>, vector<16x8xf32> -> vector<16x8xf32>
    %32 = vector.extract_strided_slice %11 {offsets = [0, 8], sizes = [16, 8], strides = [1, 1]} : vector<16x96xf32> to vector<16x8xf32>
    %cst_15 = arith.constant 0.353553385 : f32
    %33 = vector.broadcast %cst_15 : f32 to vector<16x8xf32>
    %34 = arith.mulf %32, %33 : vector<16x8xf32>
    %35 = vector.extract_strided_slice %11 {offsets = [0, 40], sizes = [16, 8], strides = [1, 1]} : vector<16x96xf32> to vector<16x8xf32>
    %36 = vector.extract_strided_slice %11 {offsets = [0, 72], sizes = [16, 8], strides = [1, 1]} : vector<16x96xf32> to vector<16x8xf32>
    %37 = tpu.transpose %35, [1, 0] : vector<16x8xf32> -> vector<8x16xf32>
    %cst_16 = arith.constant dense<0.000000e+00> : vector<16x16xf32>
    %38 = tpu.matmul %34, %37, %cst_16 {dimension_numbers = #tpu.dot_dimension_numbers<[1], [0], [0], [1], [0, 0, 1, 1], [], []>} : vector<16x8xf32>, vector<8x16xf32>, vector<16x16xf32> -> vector<16x16xf32>
    %39 = arith.addf %38, %12 : vector<16x16xf32>
    %cst_17 = arith.constant dense<0xFF800000> : vector<16xf32>
    %40 = vector.multi_reduction <maximumf>, %39, %cst_17 [1] : vector<16x16xf32> to vector<16xf32>
    %41 = vector.shape_cast %40 : vector<16xf32> to vector<16x1xf32>
    %42 = vector.broadcast %41 : vector<16x1xf32> to vector<16x16xf32>
    %43 = arith.subf %39, %42 : vector<16x16xf32>
    %44 = math.exp %43 : vector<16x16xf32>
    %cst_18 = arith.constant dense<0.000000e+00> : vector<16xf32>
    %45 = vector.multi_reduction <add>, %44, %cst_18 [1] : vector<16x16xf32> to vector<16xf32>
    %46 = vector.shape_cast %45 : vector<16xf32> to vector<16x1xf32>
    %47 = tpu.reciprocal %46 {approx = true} : vector<16x1xf32> -> vector<16x1xf32>
    %48 = vector.broadcast %47 : vector<16x1xf32> to vector<16x16xf32>
    %49 = arith.mulf %44, %48 : vector<16x16xf32>
    %cst_19 = arith.constant dense<0.000000e+00> : vector<16x8xf32>
    %50 = tpu.matmul %49, %36, %cst_19 {dimension_numbers = #tpu.dot_dimension_numbers<[1], [0], [0], [1], [0, 0, 1, 1], [], []>} : vector<16x16xf32>, vector<16x8xf32>, vector<16x8xf32> -> vector<16x8xf32>
    %51 = vector.extract_strided_slice %11 {offsets = [0, 16], sizes = [16, 8], strides = [1, 1]} : vector<16x96xf32> to vector<16x8xf32>
    %cst_20 = arith.constant 0.353553385 : f32
    %52 = vector.broadcast %cst_20 : f32 to vector<16x8xf32>
    %53 = arith.mulf %51, %52 : vector<16x8xf32>
    %54 = vector.extract_strided_slice %11 {offsets = [0, 48], sizes = [16, 8], strides = [1, 1]} : vector<16x96xf32> to vector<16x8xf32>
    %55 = vector.extract_strided_slice %11 {offsets = [0, 80], sizes = [16, 8], strides = [1, 1]} : vector<16x96xf32> to vector<16x8xf32>
    %56 = tpu.transpose %54, [1, 0] : vector<16x8xf32> -> vector<8x16xf32>
    %cst_21 = arith.constant dense<0.000000e+00> : vector<16x16xf32>
    %57 = tpu.matmul %53, %56, %cst_21 {dimension_numbers = #tpu.dot_dimension_numbers<[1], [0], [0], [1], [0, 0, 1, 1], [], []>} : vector<16x8xf32>, vector<8x16xf32>, vector<16x16xf32> -> vector<16x16xf32>
    %58 = arith.addf %57, %12 : vector<16x16xf32>
    %cst_22 = arith.constant dense<0xFF800000> : vector<16xf32>
    %59 = vector.multi_reduction <maximumf>, %58, %cst_22 [1] : vector<16x16xf32> to vector<16xf32>
    %60 = vector.shape_cast %59 : vector<16xf32> to vector<16x1xf32>
    %61 = vector.broadcast %60 : vector<16x1xf32> to vector<16x16xf32>
    %62 = arith.subf %58, %61 : vector<16x16xf32>
    %63 = math.exp %62 : vector<16x16xf32>
    %cst_23 = arith.constant dense<0.000000e+00> : vector<16xf32>
    %64 = vector.multi_reduction <add>, %63, %cst_23 [1] : vector<16x16xf32> to vector<16xf32>
    %65 = vector.shape_cast %64 : vector<16xf32> to vector<16x1xf32>
    %66 = tpu.reciprocal %65 {approx = true} : vector<16x1xf32> -> vector<16x1xf32>
    %67 = vector.broadcast %66 : vector<16x1xf32> to vector<16x16xf32>
    %68 = arith.mulf %63, %67 : vector<16x16xf32>
    %cst_24 = arith.constant dense<0.000000e+00> : vector<16x8xf32>
    %69 = tpu.matmul %68, %55, %cst_24 {dimension_numbers = #tpu.dot_dimension_numbers<[1], [0], [0], [1], [0, 0, 1, 1], [], []>} : vector<16x16xf32>, vector<16x8xf32>, vector<16x8xf32> -> vector<16x8xf32>
    %70 = vector.extract_strided_slice %11 {offsets = [0, 24], sizes = [16, 8], strides = [1, 1]} : vector<16x96xf32> to vector<16x8xf32>
    %cst_25 = arith.constant 0.353553385 : f32
    %71 = vector.broadcast %cst_25 : f32 to vector<16x8xf32>
    %72 = arith.mulf %70, %71 : vector<16x8xf32>
    %73 = vector.extract_strided_slice %11 {offsets = [0, 56], sizes = [16, 8], strides = [1, 1]} : vector<16x96xf32> to vector<16x8xf32>
    %74 = vector.extract_strided_slice %11 {offsets = [0, 88], sizes = [16, 8], strides = [1, 1]} : vector<16x96xf32> to vector<16x8xf32>
    %75 = tpu.transpose %73, [1, 0] : vector<16x8xf32> -> vector<8x16xf32>
    %cst_26 = arith.constant dense<0.000000e+00> : vector<16x16xf32>
    %76 = tpu.matmul %72, %75, %cst_26 {dimension_numbers = #tpu.dot_dimension_numbers<[1], [0], [0], [1], [0, 0, 1, 1], [], []>} : vector<16x8xf32>, vector<8x16xf32>, vector<16x16xf32> -> vector<16x16xf32>
    %77 = arith.addf %76, %12 : vector<16x16xf32>
    %cst_27 = arith.constant dense<0xFF800000> : vector<16xf32>
    %78 = vector.multi_reduction <maximumf>, %77, %cst_27 [1] : vector<16x16xf32> to vector<16xf32>
    %79 = vector.shape_cast %78 : vector<16xf32> to vector<16x1xf32>
    %80 = vector.broadcast %79 : vector<16x1xf32> to vector<16x16xf32>
    %81 = arith.subf %77, %80 : vector<16x16xf32>
    %82 = math.exp %81 : vector<16x16xf32>
    %cst_28 = arith.constant dense<0.000000e+00> : vector<16xf32>
    %83 = vector.multi_reduction <add>, %82, %cst_28 [1] : vector<16x16xf32> to vector<16xf32>
    %84 = vector.shape_cast %83 : vector<16xf32> to vector<16x1xf32>
    %85 = tpu.reciprocal %84 {approx = true} : vector<16x1xf32> -> vector<16x1xf32>
    %86 = vector.broadcast %85 : vector<16x1xf32> to vector<16x16xf32>
    %87 = arith.mulf %82, %86 : vector<16x16xf32>
    %cst_29 = arith.constant dense<0.000000e+00> : vector<16x8xf32>
    %88 = tpu.matmul %87, %74, %cst_29 {dimension_numbers = #tpu.dot_dimension_numbers<[1], [0], [0], [1], [0, 0, 1, 1], [], []>} : vector<16x16xf32>, vector<16x8xf32>, vector<16x8xf32> -> vector<16x8xf32>
    %89 = tpu.concatenate %31, %50, %69, %88 in 1 : vector<16x8xf32>, vector<16x8xf32>, vector<16x8xf32>, vector<16x8xf32> -> vector<16x32xf32>
    %c0_30 = arith.constant 0 : index
    %c0_31 = arith.constant 0 : index
    %c0_32 = arith.constant 0 : index
    %90 = vector.load %arg5[%c0_30, %c0_31, %c0_32] : memref<1x32x32xbf16, #tpu.memory_space<vmem>>, vector<1x32x32xbf16>
    %91 = vector.shape_cast %90 : vector<1x32x32xbf16> to vector<32x32xbf16>
    %92 = arith.truncf %89 : vector<16x32xf32> to vector<16x32xbf16>
    %cst_33 = arith.constant dense<0.000000e+00> : vector<16x32xf32>
    %93 = tpu.matmul %92, %91, %cst_33 {dimension_numbers = #tpu.dot_dimension_numbers<[1], [0], [0], [1], [0, 0, 1, 1], [], []>} : vector<16x32xbf16>, vector<32x32xbf16>, vector<16x32xf32> -> vector<16x32xf32>
    %c0_34 = arith.constant 0 : index
    %c0_35 = arith.constant 0 : index
    %c0_36 = arith.constant 0 : index
    %94 = vector.load %arg6[%c0_34, %c0_35, %c0_36] : memref<1x1x32xf32, #tpu.memory_space<vmem>>, vector<1x1x32xf32>
    %95 = vector.shape_cast %94 : vector<1x1x32xf32> to vector<1x32xf32>
    %96 = vector.broadcast %95 : vector<1x32xf32> to vector<16x32xf32>
    %97 = arith.addf %93, %96 : vector<16x32xf32>
    %98 = arith.addf %3, %97 : vector<16x32xf32>
    %c0_37 = arith.constant 0 : index
    %c0_38 = arith.constant 0 : index
    %c0_39 = arith.constant 0 : index
    %99 = vector.load %arg7[%c0_37, %c0_38, %c0_39] : memref<1x1x32xf32, #tpu.memory_space<vmem>>, vector<1x1x32xf32>
    %100 = vector.shape_cast %99 : vector<1x1x32xf32> to vector<1x32xf32>
    %c0_40 = arith.constant 0 : index
    %c0_41 = arith.constant 0 : index
    %c0_42 = arith.constant 0 : index
    %101 = vector.load %arg8[%c0_40, %c0_41, %c0_42] : memref<1x1x32xf32, #tpu.memory_space<vmem>>, vector<1x1x32xf32>
    %102 = vector.shape_cast %101 : vector<1x1x32xf32> to vector<1x32xf32>
    %cst_43 = arith.constant dense<0.000000e+00> : vector<16xf32>
    %103 = vector.multi_reduction <add>, %98, %cst_43 [1] : vector<16x32xf32> to vector<16xf32>
    %104 = vector.shape_cast %103 : vector<16xf32> to vector<16x1xf32>
    %cst_44 = arith.constant 3.200000e+01 : f32
    %105 = vector.broadcast %cst_44 : f32 to vector<16x1xf32>
    %106 = arith.divf %104, %105 : vector<16x1xf32>
    %107 = vector.broadcast %106 : vector<16x1xf32> to vector<16x32xf32>
    %108 = arith.subf %98, %107 : vector<16x32xf32>
    %109 = arith.mulf %108, %108 : vector<16x32xf32>
    %cst_45 = arith.constant dense<0.000000e+00> : vector<16xf32>
    %110 = vector.multi_reduction <add>, %109, %cst_45 [1] : vector<16x32xf32> to vector<16xf32>
    %111 = vector.shape_cast %110 : vector<16xf32> to vector<16x1xf32>
    %cst_46 = arith.constant 3.200000e+01 : f32
    %112 = vector.broadcast %cst_46 : f32 to vector<16x1xf32>
    %113 = arith.divf %111, %112 : vector<16x1xf32>
    %cst_47 = arith.constant 9.99999974E-6 : f32
    %114 = vector.broadcast %cst_47 : f32 to vector<16x1xf32>
    %115 = arith.addf %113, %114 : vector<16x1xf32>
    %116 = math.rsqrt %115 : vector<16x1xf32>
    %117 = vector.broadcast %116 : vector<16x1xf32> to vector<16x32xf32>
    %118 = arith.mulf %108, %117 : vector<16x32xf32>
    %119 = vector.broadcast %100 : vector<1x32xf32> to vector<16x32xf32>
    %120 = arith.mulf %118, %119 : vector<16x32xf32>
    %121 = vector.broadcast %102 : vector<1x32xf32> to vector<16x32xf32>
    %122 = arith.addf %120, %121 : vector<16x32xf32>
    %c0_48 = arith.constant 0 : index
    %c0_49 = arith.constant 0 : index
    %c0_50 = arith.constant 0 : index
    %123 = vector.load %arg9[%c0_48, %c0_49, %c0_50] : memref<1x32x64xbf16, #tpu.memory_space<vmem>>, vector<1x32x64xbf16>
    %124 = vector.shape_cast %123 : vector<1x32x64xbf16> to vector<32x64xbf16>
    %125 = arith.truncf %122 : vector<16x32xf32> to vector<16x32xbf16>
    %cst_51 = arith.constant dense<0.000000e+00> : vector<16x64xf32>
    %126 = tpu.matmul %125, %124, %cst_51 {dimension_numbers = #tpu.dot_dimension_numbers<[1], [0], [0], [1], [0, 0, 1, 1], [], []>} : vector<16x32xbf16>, vector<32x64xbf16>, vector<16x64xf32> -> vector<16x64xf32>
    %c0_52 = arith.constant 0 : index
    %c0_53 = arith.constant 0 : index
    %c0_54 = arith.constant 0 : index
    %127 = vector.load %arg10[%c0_52, %c0_53, %c0_54] : memref<1x1x64xf32, #tpu.memory_space<vmem>>, vector<1x1x64xf32>
    %128 = vector.shape_cast %127 : vector<1x1x64xf32> to vector<1x64xf32>
    %129 = vector.broadcast %128 : vector<1x64xf32> to vector<16x64xf32>
    %130 = arith.addf %126, %129 : vector<16x64xf32>
    %cst_55 = arith.constant 0.000000e+00 : f32
    %131 = vector.broadcast %cst_55 : f32 to vector<16x64xf32>
    %132 = arith.maximumf %130, %131 : vector<16x64xf32>
    %c0_56 = arith.constant 0 : index
    %c0_57 = arith.constant 0 : index
    %c0_58 = arith.constant 0 : index
    %133 = vector.load %arg11[%c0_56, %c0_57, %c0_58] : memref<1x64x32xbf16, #tpu.memory_space<vmem>>, vector<1x64x32xbf16>
    %134 = vector.shape_cast %133 : vector<1x64x32xbf16> to vector<64x32xbf16>
    %135 = arith.truncf %132 : vector<16x64xf32> to vector<16x64xbf16>
    %cst_59 = arith.constant dense<0.000000e+00> : vector<16x32xf32>
    %136 = tpu.matmul %135, %134, %cst_59 {dimension_numbers = #tpu.dot_dimension_numbers<[1], [0], [0], [1], [0, 0, 1, 1], [], []>} : vector<16x64xbf16>, vector<64x32xbf16>, vector<16x32xf32> -> vector<16x32xf32>
    %c0_60 = arith.constant 0 : index
    %c0_61 = arith.constant 0 : index
    %c0_62 = arith.constant 0 : index
    %137 = vector.load %arg12[%c0_60, %c0_61, %c0_62] : memref<1x1x32xf32, #tpu.memory_space<vmem>>, vector<1x1x32xf32>
    %138 = vector.shape_cast %137 : vector<1x1x32xf32> to vector<1x32xf32>
    %139 = vector.broadcast %138 : vector<1x32xf32> to vector<16x32xf32>
    %140 = arith.addf %136, %139 : vector<16x32xf32>
    %141 = arith.addf %122, %140 : vector<16x32xf32>
    %c0_63 = arith.constant 0 : index
    %c0_64 = arith.constant 0 : index
    %c0_65 = arith.constant 0 : index
    %142 = vector.load %arg13[%c0_63, %c0_64, %c0_65] : memref<1x1x32xf32, #tpu.memory_space<vmem>>, vector<1x1x32xf32>
    %143 = vector.shape_cast %142 : vector<1x1x32xf32> to vector<1x32xf32>
    %c0_66 = arith.constant 0 : index
    %c0_67 = arith.constant 0 : index
    %c0_68 = arith.constant 0 : index
    %144 = vector.load %arg14[%c0_66, %c0_67, %c0_68] : memref<1x1x32xf32, #tpu.memory_space<vmem>>, vector<1x1x32xf32>
    %145 = vector.shape_cast %144 : vector<1x1x32xf32> to vector<1x32xf32>
    %cst_69 = arith.constant dense<0.000000e+00> : vector<16xf32>
    %146 = vector.multi_reduction <add>, %141, %cst_69 [1] : vector<16x32xf32> to vector<16xf32>
    %147 = vector.shape_cast %146 : vector<16xf32> to vector<16x1xf32>
    %cst_70 = arith.constant 3.200000e+01 : f32
    %148 = vector.broadcast %cst_70 : f32 to vector<16x1xf32>
    %149 = arith.divf %147, %148 : vector<16x1xf32>
    %150 = vector.broadcast %149 : vector<16x1xf32> to vector<16x32xf32>
    %151 = arith.subf %141, %150 : vector<16x32xf32>
    %152 = arith.mulf %151, %151 : vector<16x32xf32>
    %cst_71 = arith.constant dense<0.000000e+00> : vector<16xf32>
    %153 = vector.multi_reduction <add>, %152, %cst_71 [1] : vector<16x32xf32> to vector<16xf32>
    %154 = vector.shape_cast %153 : vector<16xf32> to vector<16x1xf32>
    %cst_72 = arith.constant 3.200000e+01 : f32
    %155 = vector.broadcast %cst_72 : f32 to vector<16x1xf32>
    %156 = arith.divf %154, %155 : vector<16x1xf32>
    %cst_73 = arith.constant 9.99999974E-6 : f32
    %157 = vector.broadcast %cst_73 : f32 to vector<16x1xf32>
    %158 = arith.addf %156, %157 : vector<16x1xf32>
    %159 = math.rsqrt %158 : vector<16x1xf32>
    %160 = vector.broadcast %159 : vector<16x1xf32> to vector<16x32xf32>
    %161 = arith.mulf %151, %160 : vector<16x32xf32>
    %162 = vector.broadcast %143 : vector<1x32xf32> to vector<16x32xf32>
    %163 = arith.mulf %161, %162 : vector<16x32xf32>
    %164 = vector.broadcast %145 : vector<1x32xf32> to vector<16x32xf32>
    %165 = arith.addf %163, %164 : vector<16x32xf32>
    %c0_74 = arith.constant 0 : index
    %c0_75 = arith.constant 0 : index
    %166 = vector.load %arg20[%c0_74, %c0_75] : memref<16x32xf32, #tpu.memory_space<vmem>>, vector<16x32xf32>
    tpu.vector_store %arg20[%c0_74, %c0_75], %165 {strides = array<i32>} : memref<16x32xf32, #tpu.memory_space<vmem>>, vector<16x32xf32>,
    %c1_i32 = arith.constant 1 : i32
    %167 = arith.cmpi eq, %arg0, %c1_i32 : i32
    %168 = arith.extui %167 : i1 to i32
    %c0_i32_76 = arith.constant 0 : i32
    %169 = arith.cmpi ne, %168, %c0_i32_76 : i32
    scf.if %169 {
      %cst_77 = arith.constant dense<0.000000e+00> : vector<16xf32>
      %170 = vector.multi_reduction <add>, %165, %cst_77 [1] : vector<16x32xf32> to vector<16xf32>
      %171 = vector.shape_cast %170 : vector<16xf32> to vector<16x1xf32>
      %cst_78 = arith.constant 3.200000e+01 : f32
      %172 = vector.broadcast %cst_78 : f32 to vector<16x1xf32>
      %173 = arith.divf %171, %172 : vector<16x1xf32>
      %174 = vector.broadcast %173 : vector<16x1xf32> to vector<16x32xf32>
      %175 = arith.subf %165, %174 : vector<16x32xf32>
      %176 = arith.mulf %175, %175 : vector<16x32xf32>
      %cst_79 = arith.constant dense<0.000000e+00> : vector<16xf32>
      %177 = vector.multi_reduction <add>, %176, %cst_79 [1] : vector<16x32xf32> to vector<16xf32>
      %178 = vector.shape_cast %177 : vector<16xf32> to vector<16x1xf32>
      %cst_80 = arith.constant 3.200000e+01 : f32
      %179 = vector.broadcast %cst_80 : f32 to vector<16x1xf32>
      %180 = arith.divf %178, %179 : vector<16x1xf32>
      %cst_81 = arith.constant 9.99999997E-7 : f32
      %181 = vector.broadcast %cst_81 : f32 to vector<16x1xf32>
      %182 = arith.addf %180, %181 : vector<16x1xf32>
      %183 = math.rsqrt %182 : vector<16x1xf32>
      %184 = vector.broadcast %183 : vector<16x1xf32> to vector<16x32xf32>
      %185 = arith.mulf %175, %184 : vector<16x32xf32>
      %186 = arith.truncf %185 : vector<16x32xf32> to vector<16x32xbf16>
      %c0_82 = arith.constant 0 : index
      %c0_83 = arith.constant 0 : index
      %187 = vector.load %arg15[%c0_82, %c0_83] : memref<32x64xbf16, #tpu.memory_space<vmem>>, vector<32x64xbf16>
      %cst_84 = arith.constant dense<0.000000e+00> : vector<16x64xf32>
      %188 = tpu.matmul %186, %187, %cst_84 {dimension_numbers = #tpu.dot_dimension_numbers<[1], [0], [0], [1], [0, 0, 1, 1], [], []>} : vector<16x32xbf16>, vector<32x64xbf16>, vector<16x64xf32> -> vector<16x64xf32>
      %c0_85 = arith.constant 0 : index
      %c0_86 = arith.constant 0 : index
      %189 = vector.load %arg16[%c0_85, %c0_86] : memref<1x64xf32, #tpu.memory_space<vmem>>, vector<1x64xf32>
      %190 = vector.broadcast %189 : vector<1x64xf32> to vector<16x64xf32>
      %191 = arith.addf %188, %190 : vector<16x64xf32>
      %cst_87 = arith.constant 0.000000e+00 : f32
      %192 = vector.broadcast %cst_87 : f32 to vector<16x64xf32>
      %193 = arith.maximumf %191, %192 : vector<16x64xf32>
      %c0_88 = arith.constant 0 : index
      %c0_89 = arith.constant 0 : index
      %194 = vector.load %arg17[%c0_88, %c0_89] : memref<1x64xf32, #tpu.memory_space<vmem>>, vector<1x64xf32>
      %195 = vector.broadcast %194 : vector<1x64xf32> to vector<16x64xf32>
      %196 = arith.mulf %193, %195 : vector<16x64xf32>
      %cst_90 = arith.constant dense<0.000000e+00> : vector<16xf32>
      %197 = vector.multi_reduction <add>, %196, %cst_90 [1] : vector<16x64xf32> to vector<16xf32>
      %198 = vector.shape_cast %197 : vector<16xf32> to vector<16x1xf32>
      %c0_91 = arith.constant 0 : index
      %c0_92 = arith.constant 0 : index
      %199 = vector.load %arg18[%c0_91, %c0_92] : memref<1x1xf32, #tpu.memory_space<vmem>>, vector<1x1xf32>
      %200 = vector.broadcast %199 : vector<1x1xf32> to vector<16x1xf32>
      %201 = arith.addf %198, %200 : vector<16x1xf32>
      %c0_93 = arith.constant 0 : index
      %c0_94 = arith.constant 0 : index
      %202 = vector.load %arg19[%c0_93, %c0_94] : memref<16x1xf32, #tpu.memory_space<vmem>>, vector<16x1xf32>
      tpu.vector_store %arg19[%c0_93, %c0_94], %201 {strides = array<i32>} : memref<16x1xf32, #tpu.memory_space<vmem>>, vector<16x1xf32>,
    } else {
    }
    return
  }
  func.func @transform_0(%arg0: i32) -> (i32, i32) {
    %c0_i32 = arith.constant 0 : i32
    %c0_i32_0 = arith.constant 0 : i32
    %c0_i32_1 = arith.constant 0 : i32
    return %c0_i32, %c0_i32_0 : i32, i32
  }
  func.func @transform_1(%arg0: i32) -> (i32, i32) {
    %c0_i32 = arith.constant 0 : i32
    %c0_i32_0 = arith.constant 0 : i32
    %c0_i32_1 = arith.constant 0 : i32
    return %c0_i32, %c0_i32_0 : i32, i32
  }
  func.func @transform_2(%arg0: i32) -> (i32, i32, i32) {
    %c0_i32 = arith.constant 0 : i32
    %c0_i32_0 = arith.constant 0 : i32
    %c0_i32_1 = arith.constant 0 : i32
    return %arg0, %c0_i32, %c0_i32_0 : i32, i32, i32
  }
  func.func @transform_3(%arg0: i32) -> (i32, i32, i32) {
    %c0_i32 = arith.constant 0 : i32
    %c0_i32_0 = arith.constant 0 : i32
    %c0_i32_1 = arith.constant 0 : i32
    return %arg0, %c0_i32, %c0_i32_0 : i32, i32, i32
  }
  func.func @transform_4(%arg0: i32) -> (i32, i32, i32) {
    %c0_i32 = arith.constant 0 : i32
    %c0_i32_0 = arith.constant 0 : i32
    %c0_i32_1 = arith.constant 0 : i32
    return %arg0, %c0_i32, %c0_i32_0 : i32, i32, i32
  }
  func.func @transform_5(%arg0: i32) -> (i32, i32, i32) {
    %c0_i32 = arith.constant 0 : i32
    %c0_i32_0 = arith.constant 0 : i32
    %c0_i32_1 = arith.constant 0 : i32
    return %arg0, %c0_i32, %c0_i32_0 : i32, i32, i32
  }
  func.func @transform_6(%arg0: i32) -> (i32, i32, i32) {
    %c0_i32 = arith.constant 0 : i32
    %c0_i32_0 = arith.constant 0 : i32
    %c0_i32_1 = arith.constant 0 : i32
    return %arg0, %c0_i32, %c0_i32_0 : i32, i32, i32
  }
  func.func @transform_7(%arg0: i32) -> (i32, i32, i32) {
    %c0_i32 = arith.constant 0 : i32
    %c0_i32_0 = arith.constant 0 : i32
    %c0_i32_1 = arith.constant 0 : i32
    return %arg0, %c0_i32, %c0_i32_0 : i32, i32, i32
  }
  func.func @transform_8(%arg0: i32) -> (i32, i32, i32) {
    %c0_i32 = arith.constant 0 : i32
    %c0_i32_0 = arith.constant 0 : i32
    %c0_i32_1 = arith.constant 0 : i32
    return %arg0, %c0_i32, %c0_i32_0 : i32, i32, i32
  }
  func.func @transform_9(%arg0: i32) -> (i32, i32, i32) {
    %c0_i32 = arith.constant 0 : i32
    %c0_i32_0 = arith.constant 0 : i32
    %c0_i32_1 = arith.constant 0 : i32
    return %arg0, %c0_i32, %c0_i32_0 : i32, i32, i32
  }
  func.func @transform_10(%arg0: i32) -> (i32, i32, i32) {
    %c0_i32 = arith.constant 0 : i32
    %c0_i32_0 = arith.constant 0 : i32
    %c0_i32_1 = arith.constant 0 : i32
    return %arg0, %c0_i32, %c0_i32_0 : i32, i32, i32
  }
  func.func @transform_11(%arg0: i32) -> (i32, i32, i32) {
    %c0_i32 = arith.constant 0 : i32
    %c0_i32_0 = arith.constant 0 : i32
    %c0_i32_1 = arith.constant 0 : i32
    return %arg0, %c0_i32, %c0_i32_0 : i32, i32, i32
  }
  func.func @transform_12(%arg0: i32) -> (i32, i32, i32) {
    %c0_i32 = arith.constant 0 : i32
    %c0_i32_0 = arith.constant 0 : i32
    %c0_i32_1 = arith.constant 0 : i32
    return %arg0, %c0_i32, %c0_i32_0 : i32, i32, i32
  }
  func.func @transform_13(%arg0: i32) -> (i32, i32, i32) {
    %c0_i32 = arith.constant 0 : i32
    %c0_i32_0 = arith.constant 0 : i32
    %c0_i32_1 = arith.constant 0 : i32
    return %arg0, %c0_i32, %c0_i32_0 : i32, i32, i32
  }
  func.func @transform_14(%arg0: i32) -> (i32, i32) {
    %c0_i32 = arith.constant 0 : i32
    %c0_i32_0 = arith.constant 0 : i32
    %c0_i32_1 = arith.constant 0 : i32
    return %c0_i32, %c0_i32_0 : i32, i32
  }
  func.func @transform_15(%arg0: i32) -> (i32, i32) {
    %c0_i32 = arith.constant 0 : i32
    %c0_i32_0 = arith.constant 0 : i32
    %c0_i32_1 = arith.constant 0 : i32
    return %c0_i32, %c0_i32_0 : i32, i32
  }
  func.func @transform_16(%arg0: i32) -> (i32, i32) {
    %c0_i32 = arith.constant 0 : i32
    %c0_i32_0 = arith.constant 0 : i32
    %c0_i32_1 = arith.constant 0 : i32
    return %c0_i32, %c0_i32_0 : i32, i32
  }
  func.func @transform_17(%arg0: i32) -> (i32, i32) {
    %c0_i32 = arith.constant 0 : i32
    %c0_i32_0 = arith.constant 0 : i32
    %c0_i32_1 = arith.constant 0 : i32
    return %c0_i32, %c0_i32_0 : i32, i32
  }
  func.func @transform_18(%arg0: i32) -> (i32, i32) {
    %c0_i32 = arith.constant 0 : i32
    %c0_i32_0 = arith.constant 0 : i32
    %c0_i32_1 = arith.constant 0 : i32
    return %c0_i32, %c0_i32_0 : i32, i32
  }
}

</mosaic_0001>

<bundles_post_ra>
// kernel: mul.42
= control target key start
LH: loop header
LB: loop body
LE: loop exit
PB: predicated region body
PF: predicated region fallthrough
CT: control target
= control target key end

     0   :  { %vm7_vm0 = vcmask 15360   ;;  %vm13_vm1 = vcmask 31760   ;;  %s39_s0 = inlined_call_operand.vmem [shape: f32[2,2], index: 0, kind: input, shape index: {}]   ;;  %s40_s1 = inlined_call_operand.vmem [shape: f32[4], index: 1, kind: output, shape index: {}]  }
   0x1   :  { %v4_v0 = vld [vmem:[%s39_s0] sm:$0x3]  ;;  %s22_s0 = smov 2  }
   0x2   :  { %5 = vst [vmem:[#allocation1] sm:$0x3] %v4_v0 }
   0x9   :  { %v10_v1 = vld [vmem:[#allocation1 + $0x1] sm:$0x1]   ;;  %v6_v2 = vld [vmem:[#allocation1] sm:$0x1]  }
   0xa   :  { %11 = vrot.lane.b32.xlu0 %v10_v1, %s22_s0  ;;  %8 = vst.msk [vmem:[#allocation0] sm:$0x1] %vm7_vm0, %v6_v2  }
  0x7c   :  { %v12_v3 = vpop.permute.xlu0 %11  }
  0x7d   :  { %14 = vst.msk [vmem:[#allocation0] sm:$0x1] %vm13_vm1, %v12_v3  }
  0x84   :  { %v18_v4 = vld [vmem:[#allocation0] sm:$0x1] }
  0x85   :  { %20 = vst [vmem:[%s40_s1] sm:$0x1] %v18_v4 }

// kernel: _lambda_.3
= control target key start
LH: loop header
LB: loop body
LE: loop exit
PB: predicated region body
PF: predicated region fallthrough
CT: control target
= control target key end

     0   :  { %v313_v0 = vmov 0.0   ;;  %vm314_vm0 = vmmov 0   ;;  %vm183_vm1 = vcmask 654336   ;;  %vm227_vm2 = vcmask 261120   ;;  %s396_s1 = inlined_call_operand.vmem [shape: bf16[128,80], index: 1, kind: input, shape index: {}]   ;;  %s397_s3 = inlined_call_operand.vmem [shape: bf16[80,32], index: 3, kind: input, shape index: {}]   ;;  %s398_s0 = inlined_call_operand.vmem [shape: f32[8,128], index: 0, kind: input, shape index: {}]   ;;  %s399_s2 = inlined_call_operand.vmem [shape: f32[1,80], index: 2, kind: input, shape index: {}]   ;;  %s400_s4 = inlined_call_operand.vmem [shape: f32[1,32], index: 4, kind: input, shape index: {}]   ;;  %s401_s5 = inlined_call_operand.vmem [shape: f32[8,32], index: 5, kind: output, shape index: {}]  }
   0x1   :  { %264 = vmatprep.subr.bf16.mxu0 %v313_v0  ;;  %v300_v1 = vld [vmem:[%s396_s1] sm:$0xff]   ;;  %280 = vmatprep.mubr.msk.bf16.mxu0 %vm314_vm0, %v313_v0  ;;  %v301_v2 = vld [vmem:[%s396_s1 + $0x8] sm:$0xff]   ;;  %v302_v3 = vld [vmem:[%s396_s1 + $0x10] sm:$0xff]  }
   0x2   :  { %284 = vmatprep.subr.bf16.mxu1 %v313_v0  ;;  %294 = vmatprep.mubr.msk.bf16.mxu1 %vm314_vm0, %v313_v0  ;;  %v308_v4 = vld [vmem:[%s397_s3] sm:$0xff]   ;;  %v303_v5 = vld [vmem:[%s396_s1 + $0x18] sm:$0xff]   ;;  %v309_v6 = vld [vmem:[%s397_s3 + $0x8] sm:$0xff]  }
   0x3   :  { %265 = vmatpush3.bf16.msra.mxu0 %v300_v1  ;;  %285 = vmatpush3.bf16.msra.mxu1 %v308_v4  ;;  %v304_v7 = vld [vmem:[%s396_s1 + $0x20] sm:$0xff]   ;;  %v310_v8 = vld [vmem:[%s397_s3 + $0x10] sm:$0xff]   ;;  %v305_v9 = vld [vmem:[%s396_s1 + $0x28] sm:$0xff]  }
   0x4   :  { %266 = vmatprep.subr.bf16.mxu0 %v313_v0  ;;  %286 = vmatprep.subr.bf16.mxu1 %v313_v0  ;;  %v306_v10 = vld [vmem:[%s396_s1 + $0x30] sm:$0xff]   ;;  %v307_v11 = vld [vmem:[%s396_s1 + $0x38] sm:$0xff]   ;;  %v21_v12 = vld [vmem:[%s398_s0] sm:$0xff] }
   0x5   :  { %v22_v13 = vpack.c.bf16 %v21_v12, %v21_v12  ;;  %v311_v14 = vld [vmem:[%s397_s3 + $0x18] sm:$0xff]   ;;  %v312_v15 = vld [vmem:[%s397_s3 + $0x20] sm:$0xff]  }
   0x6   :  { %v233_v16 = vld [vmem:[%s399_s2] ss:$0 sm:$0xff] }
   0x7   :  { %267 = vmatpush3.bf16.msra.mxu0 %v301_v2  ;;  %287 = vmatpush3.bf16.msra.mxu1 %v309_v6  ;;  %v242_v24 = vld [vmem:[%s400_s4] ss:$0 sm:$0xff] }
   0x8   :  { %268 = vmatprep.subr.bf16.mxu0 %v313_v0  ;;  %288 = vmatprep.subr.bf16.mxu1 %v313_v0 }
   0xb   :  { %269 = vmatpush3.bf16.msra.mxu0 %v302_v3  ;;  %289 = vmatpush3.bf16.msra.mxu1 %v310_v8 }
   0xc   :  { %270 = vmatprep.subr.bf16.mxu0 %v313_v0  ;;  %290 = vmatprep.subr.bf16.mxu1 %v313_v0 }
   0xf   :  { %271 = vmatpush3.bf16.msra.mxu0 %v303_v5  ;;  %291 = vmatpush3.bf16.msra.mxu1 %v311_v14 }
  0x10   :  { %272 = vmatprep.subr.bf16.mxu0 %v313_v0  ;;  %292 = vmatprep.subr.bf16.mxu1 %v313_v0 }
  0x13   :  { %273 = vmatpush3.bf16.msra.mxu0 %v304_v7  ;;  %293 = vmatpush3.bf16.msra.mxu1 %v312_v15 }
  0x14   :  { %274 = vmatprep.subr.bf16.mxu0 %v313_v0 }
  0x17   :  { %275 = vmatpush3.bf16.msra.mxu0 %v305_v9 }
  0x18   :  { %276 = vmatprep.subr.bf16.mxu0 %v313_v0 }
  0x1b   :  { %277 = vmatpush3.bf16.msra.mxu0 %v306_v10 }
  0x1c   :  { %278 = vmatprep.subr.bf16.mxu0 %v313_v0 }
  0x1f   :  { %279 = vmatpush3.bf16.msra.mxu0 %v307_v11 }
  0x22   :  { %281 = vmatmul.mubr.bf16.vlgmr.msra.gmra.mrb[0].mxu0 %v22_v13 }
  0xf5   :  { %v128_v17 = vpop.f32.mrb[0].mxu0 }
  0xf6   :  { %v129_v18 = vadd.f32 %v233_v16, %v128_v17  ;;  %v282_v19 = vpop.f32.mrb[1].mxu0 }
  0xf7   :  { %v131_v20 = vpop.f32.mrb[2].mxu0 }
  0xf8   :  { %v134_v21 = vmax.f32 %v129_v18, 0.0  ;;  %v283_v22 = vpop.f32.mrb[3].mxu0 }
  0xfa   :  { %v135_v23 = vpack.c.bf16 %v134_v21, %v134_v21 }
  0xfc   :  { %295 = vmatmul.mubr.msk.bf16.vlgmr.msra.gmra.mrb[0].mxu1 %vm183_vm1, %v135_v23 }
 0x1cf   :  { %v221_v25 = vpop.f32.mrb[0].mxu1 }
 0x1d0   :  { %v222_v26 = vadd.f32 %v242_v24, %v221_v25  ;;  %v296_v27 = vpop.f32.mrb[1].mxu1 }
 0x1d1   :  { %v224_v28 = vpop.f32.mrb[2].mxu1 }
 0x1d2   :  { %228 = vst.msk [vmem:[%s401_s5] sm:$0xff] %vm227_vm2, %v222_v26  ;;  %v297_v29 = vpop.f32.mrb[3].mxu1 }

// kernel: _lambda_.4
= control target key start
LH: loop header
LB: loop body
LE: loop exit
PB: predicated region body
PF: predicated region fallthrough
CT: control target
= control target key end

     0   :  { %v363_v21 = vmov 0.0   ;;  %vm364_vm0 = vmmov 0   ;;  %vm233_vm1 = vcmask 261120   ;;  %vm277_vm2 = vcmask 257024   ;;  %s461_s1 = inlined_call_operand.vmem [shape: bf16[256,32], index: 1, kind: input, shape index: {}]   ;;  %s462_s0 = inlined_call_operand.vmem [shape: f32[4,256], index: 0, kind: input, shape index: {}]   ;;  %s463_s3 = inlined_call_operand.vmem [shape: bf16[32,32], index: 3, kind: input, shape index: {}]   ;;  %s464_s2 = inlined_call_operand.vmem [shape: f32[1,32], index: 2, kind: input, shape index: {}]   ;;  %s465_s4 = inlined_call_operand.vmem [shape: f32[1,32], index: 4, kind: input, shape index: {}]   ;;  %s466_s5 = inlined_call_operand.vmem [shape: f32[4,32], index: 5, kind: output, shape index: {}]  }
   0x1   :  { %v340_v0 = vld [vmem:[%s461_s1 + $0x40] sm:$0xff]   ;;  %v342_v2 = vld [vmem:[%s461_s1 + $0x48] sm:$0xff]   ;;  %v344_v4 = vld [vmem:[%s461_s1 + $0x50] sm:$0xff]   ;;  %330 = vmatprep.subr.bf16.mxu1 %v363_v21  ;;  %334 = vmatprep.mubr.msk.bf16.mxu1 %vm364_vm0, %v363_v21 }
   0x2   :  { %v341_v1 = vld [vmem:[%s461_s1] sm:$0xff]   ;;  %305 = vmatprep.subr.bf16.mxu0 %v340_v0  ;;  %v343_v3 = vld [vmem:[%s461_s1 + $0x8] sm:$0xff]   ;;  %v345_v5 = vld [vmem:[%s461_s1 + $0x10] sm:$0xff]  }
   0x3   :  { %306 = vmatpush3.bf16.msra.mxu0 %v341_v1  ;;  %v346_v6 = vld [vmem:[%s461_s1 + $0x58] sm:$0xff]   ;;  %v348_v8 = vld [vmem:[%s461_s1 + $0x60] sm:$0xff]   ;;  %v350_v10 = vld [vmem:[%s461_s1 + $0x68] sm:$0xff]  }
   0x4   :  { %307 = vmatprep.subr.bf16.mxu0 %v342_v2  ;;  %v347_v7 = vld [vmem:[%s461_s1 + $0x18] sm:$0xff]   ;;  %v349_v9 = vld [vmem:[%s461_s1 + $0x20] sm:$0xff]   ;;  %v351_v13 = vld [vmem:[%s461_s1 + $0x28] sm:$0xff]  }
   0x5   :  { %v21_v11 = vld [vmem:[%s462_s0] sm:$0xff]  ;;  %v352_v15 = vld [vmem:[%s461_s1 + $0x70] sm:$0xff]   ;;  %v354_v17 = vld [vmem:[%s461_s1 + $0x78] sm:$0xff]  }
   0x6   :  { %v23_v12 = vcombine.high %v21_v11, %v21_v11  ;;  %v353_v16 = vld [vmem:[%s461_s1 + $0x30] sm:$0xff]   ;;  %v355_v18 = vld [vmem:[%s461_s1 + $0x38] sm:$0xff]   ;;  %v25_v19 = vpack.c.bf16 %v21_v11, %v21_v11  ;;  %v357_v20 = vld [vmem:[%s463_s3] sm:$0xff]  }
   0x7   :  { %308 = vmatpush3.bf16.msra.mxu0 %v343_v3  ;;  %331 = vmatpush3.bf16.msra.mxu1 %v357_v20  ;;  %v358_v22 = vld [vmem:[%s463_s3 + $0x8] sm:$0xff]   ;;  %v283_v24 = vld [vmem:[%s464_s2] ss:$0 sm:$0xff] }
   0x8   :  { %309 = vmatprep.subr.bf16.mxu0 %v344_v4  ;;  %v26_v14 = vpack.c.bf16 %v23_v12, %v23_v12  ;;  %332 = vmatprep.subr.bf16.mxu1 %v363_v21  ;;  %v301_v36 = vld [vmem:[%s465_s4] ss:$0 sm:$0xff] }
   0xa   :  { %194 = vmatprep.mubr.bf16.mxu0 %v26_v14 }
   0xb   :  { %310 = vmatpush3.bf16.msra.mxu0 %v345_v5  ;;  %333 = vmatpush3.bf16.msra.mxu1 %v358_v22 }
   0xc   :  { %311 = vmatprep.subr.bf16.mxu0 %v346_v6 }
   0xf   :  { %312 = vmatpush3.bf16.msra.mxu0 %v347_v7 }
  0x10   :  { %313 = vmatprep.subr.bf16.mxu0 %v348_v8 }
  0x13   :  { %314 = vmatpush3.bf16.msra.mxu0 %v349_v9 }
  0x14   :  { %315 = vmatprep.subr.bf16.mxu0 %v350_v10 }
  0x17   :  { %316 = vmatpush3.bf16.msra.mxu0 %v351_v13 }
  0x18   :  { %317 = vmatprep.subr.bf16.mxu0 %v352_v15 }
  0x1b   :  { %318 = vmatpush3.bf16.msra.mxu0 %v353_v16 }
  0x1c   :  { %319 = vmatprep.subr.bf16.mxu0 %v354_v17 }
  0x1f   :  { %320 = vmatpush3.bf16.msra.mxu0 %v355_v18 }
  0x22   :  { %195 = vmatmul.mubr.bf16.vlgmr.msra.gmra.mrb[0].mxu0 %v25_v19 }
  0xf5   :  { %v321_v23 = vpop.f32.mrb[0].mxu0 }
  0xf6   :  { %v322_v25 = vpop.f32.mrb[1].mxu0 }
  0xf7   :  { %v323_v26 = vadd.f32 %v322_v25, %v321_v23  ;;  %v324_v27 = vpop.f32.mrb[2].mxu0 }
  0xf8   :  { %v325_v28 = vpop.f32.mrb[3].mxu0 }
  0xf9   :  { %v197_v29 = vadd.f32 %v323_v26, %v283_v24 }
  0xfb   :  { %v300_v30 = vmul.f32 -1.442695, %v197_v29 }
  0xfd   :  { %359 = vpow2.f32 %v300_v30 }
 0x107   :  { %v360_v31 = vpop.eup %359 }
 0x108   :  { %v205_v32 = vadd.f32 1.0, %v360_v31 }
 0x10a   :  { %361 = vrcp.f32 %v205_v32 }
 0x114   :  { %v362_v33 = vpop.eup %361 }
 0x115   :  { %v208_v34 = vmul.f32 %v362_v33, %v197_v29 }
 0x117   :  { %v209_v35 = vpack.c.bf16 %v208_v34, %v208_v34 }
 0x119   :  { %335 = vmatmul.mubr.msk.bf16.vlgmr.msra.gmra.mrb[0].mxu1 %vm233_vm1, %v209_v35 }
 0x1ec   :  { %v271_v37 = vpop.f32.mrb[0].mxu1 }
 0x1ed   :  { %v272_v38 = vadd.f32 %v301_v36, %v271_v37  ;;  %v336_v39 = vpop.f32.mrb[1].mxu1 }
 0x1ee   :  { %v274_v40 = vpop.f32.mrb[2].mxu1 }
 0x1ef   :  { %278 = vst.msk [vmem:[%s466_s5] sm:$0xf] %vm277_vm2, %v272_v38  ;;  %v337_v41 = vpop.f32.mrb[3].mxu1 }

// kernel: _lambda_.5
= control target key start
LH: loop header
LB: loop body
LE: loop exit
PB: predicated region body
PF: predicated region fallthrough
CT: control target
= control target key end

     0   :  { %s2756_s29 = smov 0   ;;  %s3054_s0 = inlined_call_operand.vmem [shape: f32[16,32], index: 0, kind: input, shape index: {}]   ;;  %s3055_s1 = inlined_call_operand.vmem [shape: f32[16,16], index: 1, kind: input, shape index: {}]   ;;  %s3056_s2 = inlined_call_operand.vmem [shape: bf16[2,32,96], index: 2, kind: input, shape index: {}]   ;;  %s3057_s3 = inlined_call_operand.vmem [shape: f32[2,1,96], index: 3, kind: input, shape index: {}]   ;;  %s3058_s4 = inlined_call_operand.vmem [shape: bf16[2,32,32], index: 4, kind: input, shape index: {}]   ;;  %s3059_s5 = inlined_call_operand.vmem [shape: f32[2,1,32], index: 5, kind: input, shape index: {}]   ;;  %s3060_s6 = inlined_call_operand.vmem [shape: f32[2,1,32], index: 6, kind: input, shape index: {}]   ;;  %s3061_s7 = inlined_call_operand.vmem [shape: f32[2,1,32], index: 7, kind: input, shape index: {}]   ;;  %s3062_s8 = inlined_call_operand.vmem [shape: bf16[2,32,64], index: 8, kind: input, shape index: {}]   ;;  %s3063_s9 = inlined_call_operand.vmem [shape: f32[2,1,64], index: 9, kind: input, shape index: {}]   ;;  %s3064_s10 = inlined_call_operand.vmem [shape: bf16[2,64,32], index: 10, kind: input, shape index: {}]   ;;  %s3065_s11 = inlined_call_operand.vmem [shape: f32[2,1,32], index: 11, kind: input, shape index: {}]   ;;  %s3066_s12 = inlined_call_operand.vmem [shape: f32[2,1,32], index: 12, kind: input, shape index: {}]   ;;  %s3067_s13 = inlined_call_operand.vmem [shape: f32[2,1,32], index: 13, kind: input, shape index: {}]   ;;  %s3068_s14 = inlined_call_operand.vmem [shape: bf16[32,64], index: 14, kind: input, shape index: {}]   ;;  %s3069_s15 = inlined_call_operand.vmem [shape: f32[1,64], index: 15, kind: input, shape index: {}]   ;;  %s3070_s16 = inlined_call_operand.vmem [shape: f32[1,64], index: 16, kind: input, shape index: {}]   ;;  %s3071_s17 = inlined_call_operand.<no memory space> [shape: f32[1,1], index: 17, kind: input, shape index: {}]   ;;  %s3072_s18 = inlined_call_operand.vmem [shape: f32[16,1], index: 18, kind: output, shape index: {}]  }
   0x1   :  { %3078 = sst [smem:[#allocation5_spill]] %s3054_s0  ;;  %v23_v0 = vstv %s3071_s17 }
   0x2   :  { %3079 = sst [smem:[#allocation6_spill]] %s3055_s1  ;;  %24 = vst [vmem:[#allocation3] sm:$0x1] %v23_v0 }
   0x3   :  { %3080 = sst [smem:[#allocation7_spill]] %s3056_s2 }
   0x4   :  { %3081 = sst [smem:[#allocation8_spill]] %s3058_s4 }
   0x5   :  { %3082 = sst [smem:[#allocation9_spill]] %s3068_s14 }
   0x6   :  { %3083 = sst [smem:[#allocation10_spill]] %s3069_s15 }
   0x7   :  { %3084 = sst [smem:[#allocation11_spill]] %s3070_s16 }
   0x8   :  { %3085 = sst [smem:[#allocation12_spill]] %s3072_s18 }
   0x9 LB: > { %3086 = sst [smem:[#allocation4_spill]] %s2638_s29  ;;  %s2762_s30 = sadd.s32 4294967295, %s2638_s29   ;;  %s2638_s29 = sphi %s2756_s29, %s30_s29  }
   0xa   : > { %p2237_p0 = scmp.ge.s32.totalorder %s2638_s29, 1  ;;  %p603_p1 = scmp.lt.s32.totalorder %s2638_s29, 3 }
   0xc   : > { %p604_p2 = pnand %p2237_p0, %p603_p1 }
   0xd   : > { %p691_p3 = scmp.lt.s32.totalorder (!%p604_p2), %s2762_s30, 1  ;;  %s3087_s2 = sld [smem:[#allocation7_spill]] (!%p604_p2) }
   0xe   : > { %607 = sbr.rel (%p604_p2) target bundleno = 3807 (0xedf), region = 92  ;;  %s3088_s4 = sld [smem:[#allocation8_spill]] (!%p604_p2) }
   0xf   : > { %p2246_p4 = scmp.ne.s32.totalorder (!%p604_p2), %s2762_s30, 0 }
  0x15   : > { %s2768_s17 = scalar_select %p691_p3, %s2762_s30, 1 }
  0x16   : > { %739 = sbr.rel (%p2246_p4) target bundleno = 30 (0x1e), region = 96  ;;  %s3089_s27 = sld [smem:[#allocation5_spill]] (!%p2246_p4)  ;;  %vm742_vm0 = vcmask (!%p2246_p4), 261120  }
  0x17   : > { %s2302_s0 = sshll.u32 %s2768_s17, 4  ;;  %s720_s25 = scalar_lea.vmem %s3063_s9, %s2768_s17 }
  0x18   : > { %s695_s23 = scalar_lea.vmem %s3087_s2, %s2302_s0  ;;  %s2781_s26 = scalar_lea.vmem %s3088_s4, %s2302_s0 }
  0x19   : > { %s2798_s22 = scalar_lea.vmem %s3062_s8, %s2302_s0  ;;  %s2305_s4 = sshll.u32 %s2768_s17, 5 }
  0x1a   : > { %s2808_s29 = scalar_lea.vmem %s3064_s10, %s2305_s4  ;;  %s728_s14 = scalar_lea.vmem %s3065_s11, %s2768_s17 }
  0x1b   : > { %s731_s20 = scalar_lea.vmem %s3066_s12, %s2768_s17  ;;  %s734_s15 = scalar_lea.vmem %s3067_s13, %s2768_s17 }
  0x1c   : > { %v740_v1 = vld [vmem:[%s3089_s27] sm:$0xff] (!%p2246_p4)  ;;  %v741_v2 = vld [vmem:[%s3089_s27 + $0x8] sm:$0xff] (!%p2246_p4) }
  0x1d   : > { %743 = vst.msk [vmem:[#allocation2] sm:$0xff] %vm742_vm0, %v740_v1  ;;  %744 = vst.msk [vmem:[#allocation2 + $0x8] sm:$0xff] %vm742_vm0, %v741_v2 }
  0x1e PF: > { %v2576_v3 = vld [vmem:[%s695_s23] sm:$0xff]   ;;  %v2640_v4 = vmov 0.0   ;;  %v2577_v5 = vld [vmem:[%s695_s23 + $0x8] sm:$0xff]   ;;  %vm2641_vm1 = vmmov 0   ;;  %vm771_vm2 = vcmask 261120   ;;  %s3090_s23 = scalar_lea.vmem %s3057_s3, %s2768_s17  ;;  %vm826_vm3 = vcmask 64512  }
  0x1f   : > { %2355 = vmatprep.subr.bf16.mxu1 %v2640_v4  ;;  %2359 = vmatprep.mubr.msk.bf16.mxu1 %vm2641_vm1, %v2640_v4  ;;  %v2247_v9 = vld [vmem:[%s3090_s23] ss:$0 sm:$0xff]  ;;  %s2642_s18 = smov 120   ;;  %s2643_s19 = smov 96   ;;  %vm2863_vm4 = vmpackc.low %vm826_vm3, %vm826_vm3  ;;  %vm912_vm5 = vcmask 130048   ;;  %vm1650_vm6 = vcmask 195584  }
  0x20   : > { %2356 = vmatpush3.bf16.msra.mxu1 %v2576_v3  ;;  %s2644_s0 = smov 80   ;;  %s2645_s21 = smov 88   ;;  %vm1878_vm7 = vcmask 523264  }
  0x21   : > { %2357 = vmatprep.subr.bf16.mxu1 %v2640_v4  ;;  %s2646_s2 = smov 112   ;;  %s3093_s28 = sld [smem:[#allocation6_spill]] }
  0x22   : > { %s2647_s23 = smov 56   ;;  %s2653_s24 = smov 16  }
  0x23   : > { %s2654_s4 = smov 40   ;;  %s2655_s1 = smov 24  }
  0x24   : > { %v2832_v6 = vld [vmem:[#allocation2] sm:$0xff]  ;;  %v2834_v7 = vld [vmem:[#allocation2 + $0x8] sm:$0xff]  ;;  %2358 = vmatpush3.bf16.msra.mxu1 %v2577_v5  ;;  %p2293_p5 = scmp.ne.s32.totalorder %s2762_s30, 1 }
  0x25   : > { %v751_v8 = vpack.c.bf16 %v2834_v7, %v2832_v6  ;;  %vm2657_vm8 = vmmov (!%p2293_p5), 0   ;;  %vm2095_vm9 = vcmask (!%p2293_p5), 7168  }
  0x27   : > { %2360 = vmatmul.mubr.msk.bf16.vlgmr.msra.gmra.mrb[0].mxu1 %vm771_vm2, %v751_v8  ;;  %v2887_v36 = vld [vmem:[%s3093_s28 + $0x8] sm:$0xff]  ;;  %v2892_v37 = vld [vmem:[%s3093_s28] sm:$0xff] }
  0xfa   : > { %v809_v10 = vpop.f32.mrb[0].mxu1 }
  0xfb   : > { %v810_v11 = vadd.f32 %v2247_v9, %v809_v10  ;;  %v2361_v12 = vpop.f32.mrb[1].mxu1 }
  0xfc   : > { %v812_v13 = vpop.f32.mrb[2].mxu1 }
  0xfd   : > { %v813_v14 = vadd.f32 %v2247_v9, %v812_v13  ;;  %v2362_v15 = vpop.f32.mrb[3].mxu1  ;;  %v2845_v16 = vmul.f32 0.35355338, %v810_v11 }
  0xff   : > { %1022 = vrot.lane.b32.xlu1 %v2845_v16, %s2642_s18  ;;  %2367 = vmatprep.mubr.msk.f32.mxu1 %vm826_vm3, %v2845_v16  ;;  %v2850_v17 = vpack.i.bf16 %v813_v14, %v810_v11  ;;  %v2856_v18 = vmul.f32 0.35355338, %v813_v14 }
 0x101   : > { %2522 = vrot.lane.b32.xlu0 %v2850_v17, %s2643_s19  ;;  %s2649_s19 = smov 48  }
 0x103   : > { %2532 = vrot.lane.b32.xlu1 %v2850_v17, %s2644_s0  ;;  %s2650_s0 = smov 72  }
 0x105   : > { %2527 = vrot.lane.b32.xlu0 %v2850_v17, %s2645_s21  ;;  %s2651_s21 = smov 104  }
 0x107   : > { %1222 = vrot.lane.b32.xlu1 %v2845_v16, %s2646_s2 }
 0x109   : > { %1024 = vrot.lane.b32.xlu0 %v2856_v18, %s2642_s18  ;;  %s2648_s18 = smov 64  }
 0x10d   : > { %1224 = vrot.lane.b32.xlu0 %v2856_v18, %s2646_s2  ;;  %s2652_s2 = smov 8  }
 0x171   : > { %v1023_v19 = vpop.permute.xlu1 %1022 }
 0x172   : > { %2381 = vmatprep.mubr.msk.f32.mxu0 %vm826_vm3, %v1023_v19 }
 0x173   : > { %v2523_v20 = vpop.permute.xlu0 %2522 }
 0x174   : > { %v2525_v21 = vunpack.i.h.bf16 %v2523_v20  ;;  %v2524_v22 = vunpack.i.l.bf16 %v2523_v20 }
 0x175   : > { %v2533_v23 = vpop.permute.xlu1 %2532 }
 0x176   : > { %v2455_v25 = vpack.c.bf16 %v2525_v21, %v2524_v22  ;;  %v2535_v27 = vunpack.i.h.bf16 %v2533_v23  ;;  %v2534_v28 = vunpack.i.l.bf16 %v2533_v23 }
 0x177   : > { %v2528_v26 = vpop.permute.xlu0 %2527 }
 0x178   : > { %v2530_v29 = vunpack.i.h.bf16 %v2528_v26  ;;  %v2529_v30 = vunpack.i.l.bf16 %v2528_v26  ;;  %2457 = vmatprep.subr.msk.bf16.mxu1 %vm2863_vm4, %v2455_v25  ;;  %v2475_v32 = vpack.c.bf16 %v2535_v27, %v2534_v28 }
 0x179   : > { %2460 = vmatpush3.bf16.xpose.msk.msra.mxu1 %vm2863_vm4, %v2455_v25  ;;  %v1223_v34 = vpop.permute.xlu1 %1222 }
 0x17a   : > { %v2465_v31 = vpack.c.bf16 %v2530_v29, %v2529_v30 }
 0x17b   : > { %v1025_v33 = vpop.permute.xlu0 %1024 }
 0x17c   : > { %2467 = vmatprep.subr.msk.bf16.mxu0 %vm2863_vm4, %v2465_v31 }
 0x17d   : > { %2470 = vmatpush3.bf16.xpose.msk.msra.mxu0 %vm2863_vm4, %v2465_v31 }
 0x17e   : > { %2477 = vmatprep.subr.msk.bf16.mxu0 %vm2863_vm4, %v2475_v32 }
 0x17f   : > { %v1225_v35 = vpop.permute.xlu0 %1224 }
 0x180   : > { %2368 = vmatmul.mubr.msk.f32.vlgmr.msra.gmra.mrb[4].mxu1 %vm826_vm3, %v2856_v18 }
 0x184   : > { %2382 = vmatmul.mubr.msk.f32.vlgmr.msra.gmra.mrb[0].mxu0 %vm826_vm3, %v1025_v33 }
 0x185   : > { %2480 = vmatpush3.bf16.xpose.msk.msra.mxu0 %vm2863_vm4, %v2475_v32  ;;  %2395 = vmatprep.mubr.msk.f32.mxu0 %vm826_vm3, %v1223_v34 }
 0x18c   : > { %2396 = vmatmul.mubr.msk.f32.vlgmr.msra.gmra.mrb[2].mxu0 %vm826_vm3, %v1225_v35 }
 0x253   : > { %v2369_v38 = vpop.f32.mrb[4].mxu1 }
 0x254   : > { %v909_v39 = vadd.f32 %v2369_v38, %v2887_v36  ;;  %v903_v40 = vpop.f32.mrb[5].mxu1 }
 0x255   : > { %v904_v41 = vadd.f32 %v903_v40, %v2892_v37 }
 0x256   : > { %v916_v42 = vsel %vm912_vm5, %v909_v39, -inf }
 0x257   : > { %v2383_v43 = vpop.f32.mrb[0].mxu0  ;;  %917 = vmax.xlane.f32.xlu0 %v916_v42  ;;  %v913_v44 = vsel %vm912_vm5, %v904_v41, -inf }
 0x258   : > { %v1110_v45 = vadd.f32 %v2383_v43, %v2887_v36  ;;  %v1104_v46 = vpop.f32.mrb[1].mxu0  ;;  %914 = vmax.xlane.f32.xlu1 %v913_v44 }
 0x259   : > { %v1105_v47 = vadd.f32 %v1104_v46, %v2892_v37 }
 0x25a   : > { %v1116_v48 = vsel %vm912_vm5, %v1110_v45, -inf }
 0x25b   : > { %v1113_v49 = vsel %vm912_vm5, %v1105_v47, -inf }
 0x25c   : > { %1114 = vmax.xlane.f32.xlu0 %v1113_v49  ;;  %1117 = vmax.xlane.f32.xlu1 %v1116_v48 }
 0x25f   : > { %v2397_v50 = vpop.f32.mrb[2].mxu0 }
 0x260   : > { %v2903_v51 = vadd.f32 %v2397_v50, %v2887_v36  ;;  %v1304_v52 = vpop.f32.mrb[3].mxu0 }
 0x261   : > { %v1305_v53 = vadd.f32 %v1304_v52, %v2892_v37 }
 0x262   : > { %v1316_v54 = vsel %vm912_vm5, %v2903_v51, -inf }
 0x263   : > { %1317 = vmax.xlane.f32.xlu1 %v1316_v54  ;;  %v1313_v55 = vsel %vm912_vm5, %v1305_v53, -inf }
 0x264   : > { %1314 = vmax.xlane.f32.xlu0 %v1313_v55 }
 0x274   : > { %2542 = vrot.lane.b32.xlu1 %v2850_v17, %s2647_s23  ;;  %s3094_s23 = scalar_lea.vmem %s3059_s5, %s2768_s17 }
 0x27a   : > { %2537 = vrot.lane.b32.xlu0 %v2850_v17, %s2648_s18 }
 0x2e4   : > { %v918_v56 = vpop.xlane.xlu0 %917 }
 0x2e5   : > { %v920_v57 = vsub.f32 %v909_v39, %v918_v56  ;;  %v915_v58 = vpop.xlane.xlu1 %914 }
 0x2e6   : > { %v919_v59 = vsub.f32 %v904_v41, %v915_v58 }
 0x2e7   : > { %v923_v60 = vmul.f32 1.442695, %v920_v57 }
 0x2e8   : > { %v921_v61 = vmul.f32 1.442695, %v919_v59 }
 0x2e9   : > { %2586 = vpow2.f32 %v923_v60  ;;  %v1115_v62 = vpop.xlane.xlu0 %1114  ;;  %v1118_v63 = vpop.xlane.xlu1 %1117 }
 0x2ea   : > { %2588 = vpow2.f32 %v921_v61  ;;  %v1119_v0 = vsub.f32 %v1105_v47, %v1115_v62  ;;  %v1120_v1 = vsub.f32 %v1110_v45, %v1118_v63 }
 0x2ec   : > { %v1121_v2 = vmul.f32 1.442695, %v1119_v0  ;;  %v1123_v3 = vmul.f32 1.442695, %v1120_v1 }
 0x2ee   : > { %2590 = vpow2.f32 %v1121_v2 }
 0x2ef   : > { %2592 = vpow2.f32 %v1123_v3 }
 0x2f0   : > { %v1318_v5 = vpop.xlane.xlu1 %1317 }
 0x2f1   : > { %v1315_v8 = vpop.xlane.xlu0 %1314  ;;  %v1320_v33 = vsub.f32 %v2903_v51, %v1318_v5 }
 0x2f2   : > { %v1319_v9 = vsub.f32 %v1305_v53, %v1315_v8 }
 0x2f3   : > { %v2587_v10 = vpop.eup %2586  ;;  %v1323_v34 = vmul.f32 1.442695, %v1320_v33 }
 0x2f4   : > { %v2589_v11 = vpop.eup %2588  ;;  %v1321_v12 = vmul.f32 1.442695, %v1319_v9  ;;  %v2543_v13 = vpop.permute.xlu1 %2542  ;;  %v928_v14 = vsel %vm912_vm5, %v2587_v10, 0.0 }
 0x2f5   : > { %v2545_v15 = vunpack.i.h.bf16 %v2543_v13  ;;  %v2538_v19 = vpop.permute.xlu0 %2537  ;;  %929 = vadd.xlane.f32.xlu1 %v928_v14  ;;  %v925_v20 = vsel %vm912_vm5, %v2589_v11, 0.0  ;;  %v2544_v21 = vunpack.i.l.bf16 %v2543_v13 }
 0x2f6   : > { %2594 = vpow2.f32 %v1321_v12  ;;  %v2540_v22 = vunpack.i.h.bf16 %v2538_v19  ;;  %v2539_v23 = vunpack.i.l.bf16 %v2538_v19  ;;  %926 = vadd.xlane.f32.xlu0 %v925_v20 }
 0x2f7   : > { %v2471_v29 = vpack.c.bf16 %v2545_v15, %v2544_v21  ;;  %2596 = vpow2.f32 %v1323_v34 }
 0x2f8   : > { %v2591_v25 = vpop.eup %2590  ;;  %v2461_v26 = vpack.c.bf16 %v2540_v22, %v2539_v23 }
 0x2f9   : > { %v2593_v27 = vpop.eup %2592  ;;  %v1125_v28 = vsel %vm912_vm5, %v2591_v25, 0.0 }
 0x2fa   : > { %2462 = vmatprep.subr.bf16.mxu1 %v2461_v26  ;;  %1126 = vadd.xlane.f32.xlu0 %v1125_v28  ;;  %v1128_v30 = vsel %vm912_vm5, %v2593_v27, 0.0 }
 0x2fb   : > { %1129 = vadd.xlane.f32.xlu1 %v1128_v30  ;;  %2464 = vmatpush3.bf16.msra.mxu1 %v2461_v26 }
 0x2fc   : > { %2472 = vmatprep.subr.bf16.mxu1 %v2471_v29 }
 0x300   : > { %v2595_v31 = vpop.eup %2594 }
 0x301   : > { %v1325_v32 = vsel %vm912_vm5, %v2595_v31, 0.0  ;;  %v2597_v35 = vpop.eup %2596 }
 0x302   : > { %1326 = vadd.xlane.f32.xlu0 %v1325_v32  ;;  %v1328_v38 = vsel %vm912_vm5, %v2597_v35, 0.0 }
 0x30c   : > { %2547 = vrot.lane.b32.xlu1 %v2850_v17, %s2649_s19  ;;  %s3095_s19 = scalar_lea.vmem %s3060_s6, %s2768_s17 }
 0x318   : > { %2552 = vrot.lane.b32.xlu0 %v2850_v17, %s2650_s0 }
 0x31c   : > { %1424 = vrot.lane.b32.xlu0 %v2856_v18, %s2651_s21 }
 0x330   : > { %1329 = vadd.xlane.f32.xlu1 %v1328_v38 }
 0x341   : > { %1422 = vrot.lane.b32.xlu1 %v2845_v16, %s2651_s21 }
 0x382   : > { %v930_v39 = vpop.xlane.xlu1 %929 }
 0x383   : > { %2598 = vrcp.f32 %v930_v39  ;;  %v927_v40 = vpop.xlane.xlu0 %926 }
 0x384   : > { %2600 = vrcp.f32 %v927_v40 }
 0x387   : > { %v1127_v41 = vpop.xlane.xlu0 %1126 }
 0x388   : > { %2602 = vrcp.f32 %v1127_v41  ;;  %v1130_v42 = vpop.xlane.xlu1 %1129  ;;  %v2579_v41 = vld [vmem:[%s2781_s26 + $0x8] sm:$0xff]  }
 0x389   : > { %2604 = vrcp.f32 %v1130_v42 }
 0x38c   : > { %v2548_v43 = vpop.permute.xlu1 %2547 }
 0x38d   : > { %v2599_v44 = vpop.eup %2598  ;;  %v2550_v18 = vunpack.i.h.bf16 %v2548_v43  ;;  %v2549_v46 = vunpack.i.l.bf16 %v2548_v43 }
 0x38e   : > { %v2601_v45 = vpop.eup %2600  ;;  %v934_v49 = vmul.f32 %v2599_v44, %v2587_v10 }
 0x38f   : > { %v1327_v47 = vpop.xlane.xlu0 %1326  ;;  %v933_v48 = vmul.f32 %v2601_v45, %v2589_v11  ;;  %v2481_v50 = vpack.c.bf16 %v2550_v18, %v2549_v46 }
 0x390   : > { %2606 = vrcp.f32 %v1327_v47 }
 0x391   : > { %2374 = vmatprep.mubr.msk.f32.mxu1 %vm912_vm5, %v933_v48 }
 0x392   : > { %v2603_v16 = vpop.eup %2602  ;;  %2375 = vmatmul.mubr.msk.f32.vlgmr.msra.gmra.mrb[6].mxu1 %vm912_vm5, %v934_v49 }
 0x393   : > { %v2605_v51 = vpop.eup %2604  ;;  %2474 = vmatpush3.bf16.msra.mxu1 %v2471_v29  ;;  %v2553_v52 = vpop.permute.xlu0 %2552  ;;  %v1133_v53 = vmul.f32 %v2603_v16, %v2591_v25 }
 0x394   : > { %v1134_v54 = vmul.f32 %v2605_v51, %v2593_v27  ;;  %v2555_v55 = vunpack.i.h.bf16 %v2553_v52  ;;  %v2554_v56 = vunpack.i.l.bf16 %v2553_v52  ;;  %2482 = vmatprep.subr.bf16.mxu1 %v2481_v50 }
 0x395   : > { %2388 = vmatprep.mubr.msk.f32.mxu1 %vm912_vm5, %v1133_v53 }
 0x396   : > { %v2485_v57 = vpack.c.bf16 %v2555_v55, %v2554_v56  ;;  %2389 = vmatmul.mubr.msk.f32.vlgmr.msra.gmra.mrb[8].mxu1 %vm912_vm5, %v1134_v54 }
 0x397   : > { %2484 = vmatpush3.bf16.msra.mxu1 %v2481_v50  ;;  %v1425_v0 = vpop.permute.xlu0 %1424 }
 0x398   : > { %2487 = vmatprep.subr.msk.bf16.mxu1 %vm2863_vm4, %v2485_v57 }
 0x39a   : > { %v2607_v58 = vpop.eup %2606 }
 0x39b   : > { %v1333_v59 = vmul.f32 %v2607_v58, %v2595_v31 }
 0x39d   : > { %2402 = vmatprep.mubr.msk.f32.mxu1 %vm912_vm5, %v1333_v59  ;;  %v2275_v59 = vld [vmem:[%s3094_s23] ss:$0 sm:$0xff] }
 0x3bd   : > { %v1330_v60 = vpop.xlane.xlu1 %1329 }
 0x3be   : > { %2608 = vrcp.f32 %v1330_v60 }
 0x3c1   : > { %v1423_v63 = vpop.permute.xlu1 %1422 }
 0x3c8   : > { %v2609_v61 = vpop.eup %2608 }
 0x3c9   : > { %v1334_v62 = vmul.f32 %v2609_v61, %v2597_v35 }
 0x3cb   : > { %2403 = vmatmul.mubr.msk.f32.vlgmr.msra.gmra.mrb[10].mxu1 %vm912_vm5, %v1334_v62 }
 0x3cc   : > { %2490 = vmatpush3.bf16.xpose.msk.msra.mxu1 %vm2863_vm4, %v2485_v57  ;;  %2409 = vmatprep.mubr.msk.f32.mxu1 %vm826_vm3, %v1423_v63 }
 0x3cd   : > { %2427 = vmatprep.subr.bf16.mxu1 %v2640_v4 }
 0x3d3   : > { %2410 = vmatmul.mubr.msk.f32.vlgmr.msra.gmra.mrb[12].mxu1 %vm826_vm3, %v1425_v0 }
 0x3d4   : > { %2431 = vmatprep.mubr.msk.bf16.mxu1 %vm2641_vm1, %v2640_v4 }
 0x465   : > { %v2937_v1 = vpop.f32.mrb[6].mxu1 }
 0x466   : > { %v2939_v2 = vpop.f32.mrb[7].mxu1 }
 0x469   : > { %v2390_v3 = vpop.f32.mrb[8].mxu1 }
 0x46a   : > { %v1213_v5 = vpop.f32.mrb[9].mxu1 }
 0x46b   : > { %v2561_v8 = vpack.i.bf16 %v2390_v3, %v1213_v5 }
 0x49e   : > { %v2404_v9 = vpop.f32.mrb[10].mxu1 }
 0x49f   : > { %v1413_v24 = vpop.f32.mrb[11].mxu1 }
 0x4a0   : > { %v2566_v10 = vpack.i.bf16 %v2404_v9, %v1413_v24 }
 0x4a6   : > { %v2411_v11 = vpop.f32.mrb[12].mxu1 }
 0x4a7   : > { %v1510_v12 = vadd.f32 %v2411_v11, %v2887_v36  ;;  %v1504_v13 = vpop.f32.mrb[13].mxu1 }
 0x4a8   : > { %v1505_v14 = vadd.f32 %v1504_v13, %v2892_v37 }
 0x4a9   : > { %v1516_v15 = vsel %vm912_vm5, %v1510_v12, -inf }
 0x4aa   : > { %1517 = vmax.xlane.f32.xlu0 %v1516_v15  ;;  %v1513_v19 = vsel %vm912_vm5, %v1505_v14, -inf }
 0x4ab   : > { %1514 = vmax.xlane.f32.xlu1 %v1513_v19  ;;  %v2580_v19 = vld [vmem:[%s2798_s22] sm:$0xff]  }
 0x4ac   : > { %2428 = vmatpush3.bf16.msra.mxu1 %v2580_v19  ;;  %v2292_v19 = vld [vmem:[%s734_s15] ss:$0 sm:$0xff] }
 0x4ad   : > { %2429 = vmatprep.subr.bf16.mxu1 %v2640_v4 }
 0x537   : > { %v1518_v20 = vpop.xlane.xlu0 %1517 }
 0x538   : > { %v1520_v21 = vsub.f32 %v1510_v12, %v1518_v20  ;;  %v1515_v22 = vpop.xlane.xlu1 %1514  ;;  %v2581_v20 = vld [vmem:[%s2798_s22 + $0x8] sm:$0xff]  }
 0x539   : > { %v1519_v23 = vsub.f32 %v1505_v14, %v1515_v22  ;;  %2430 = vmatpush3.bf16.msra.mxu1 %v2581_v20  ;;  %v2583_v22 = vld [vmem:[%s2808_s29 + $0x8] sm:$0xff]  }
 0x53a   : > { %v1523_v25 = vmul.f32 1.442695, %v1520_v21  ;;  %v2582_v21 = vld [vmem:[%s2808_s29] sm:$0xff]  }
 0x53b   : > { %v1521_v26 = vmul.f32 1.442695, %v1519_v23 }
 0x53c   : > { %2610 = vpow2.f32 %v1523_v25 }
 0x53d   : > { %2612 = vpow2.f32 %v1521_v26 }
 0x546   : > { %v2611_v27 = vpop.eup %2610 }
 0x547   : > { %v2613_v28 = vpop.eup %2612  ;;  %v1528_v36 = vsel %vm912_vm5, %v2611_v27, 0.0 }
 0x548   : > { %1529 = vadd.xlane.f32.xlu1 %v1528_v36  ;;  %v1525_v37 = vsel %vm912_vm5, %v2613_v28, 0.0 }
 0x549   : > { %1526 = vadd.xlane.f32.xlu0 %v1525_v37 }
 0x559   : > { %2562 = vrot.lane.b32.xlu1 %v2561_v8, %s2652_s2  ;;  %s3096_s2 = scalar_lea.vmem %s3061_s7, %s2768_s17  ;;  %s3097_s17 = sld [smem:[#allocation9_spill]] (!%p2293_p5) }
 0x55d   : > { %2567 = vrot.lane.b32.xlu1 %v2566_v10, %s2653_s24 }
 0x55f   : > { %2557 = vrot.lane.b32.xlu0 %v2850_v17, %s2654_s4  ;;  %v2578_v17 = vld [vmem:[%s2781_s26] sm:$0xff]  }
 0x5d5   : > { %v1530_v29 = vpop.xlane.xlu1 %1529 }
 0x5d6   : > { %2614 = vrcp.f32 %v1530_v29  ;;  %v1527_v30 = vpop.xlane.xlu0 %1526  ;;  %v2279_v29 = vld [vmem:[%s3095_s19] ss:$0 sm:$0xff]  ;;  %s3098_s19 = sld [smem:[#allocation10_spill]] (!%p2293_p5) }
 0x5d7   : > { %2616 = vrcp.f32 %v1527_v30 }
 0x5d9   : > { %v2563_v45 = vpop.permute.xlu1 %2562 }
 0x5da   : > { %v2558_v31 = vpop.permute.xlu0 %2557  ;;  %v2565_v46 = vunpack.i.h.bf16 %v2563_v45  ;;  %v2564_v47 = vunpack.i.l.bf16 %v2563_v45 }
 0x5db   : > { %v2560_v32 = vunpack.i.h.bf16 %v2558_v31  ;;  %v2559_v33 = vunpack.i.l.bf16 %v2558_v31 }
 0x5dc   : > { %v1647_v50 = vsel %vm826_vm3, %v2937_v1, %v2565_v46  ;;  %v1646_v51 = vsel %vm826_vm3, %v2939_v2, %v2564_v47 }
 0x5dd   : > { %v2491_v34 = vpack.c.bf16 %v2560_v32, %v2559_v33  ;;  %v2568_v18 = vpop.permute.xlu1 %2567 }
 0x5de   : > { %v2570_v48 = vunpack.i.h.bf16 %v2568_v18  ;;  %v2569_v49 = vunpack.i.l.bf16 %v2568_v18 }
 0x5df   : > { %2492 = vmatprep.subr.bf16.mxu0 %v2491_v34 }
 0x5e0   : > { %v2615_v35 = vpop.eup %2614  ;;  %2494 = vmatpush3.bf16.msra.mxu0 %v2491_v34  ;;  %v1648_v54 = vsel %vm912_vm5, %v1646_v51, %v2569_v49  ;;  %v1649_v55 = vsel %vm912_vm5, %v1647_v50, %v2570_v48  ;;  %v2280_v34 = vld [vmem:[%s3096_s2] ss:$0 sm:$0xff]  ;;  %s3099_s2 = sld [smem:[#allocation11_spill]] (!%p2293_p5) }
 0x5e1   : > { %v2617_v38 = vpop.eup %2616  ;;  %2419 = vmatprep.subr.bf16.mxu0 %v2640_v4  ;;  %v1534_v40 = vmul.f32 %v2615_v35, %v2611_v27 }
 0x5e2   : > { %v1533_v39 = vmul.f32 %v2617_v38, %v2613_v28 }
 0x5e4   : > { %2416 = vmatprep.mubr.msk.f32.mxu0 %vm912_vm5, %v1533_v39 }
 0x5e5   : > { %2417 = vmatmul.mubr.msk.f32.vlgmr.msra.gmra.mrb[4].mxu0 %vm912_vm5, %v1534_v40 }
 0x5e6   : > { %2423 = vmatprep.mubr.msk.bf16.mxu0 %vm2641_vm1, %v2640_v4  ;;  %2420 = vmatpush3.bf16.msra.mxu0 %v2578_v17  ;;  %v2584_v17 = vld [vmem:[%s2808_s29 + $0x10] sm:$0xff]  }
 0x5e7   : > { %2421 = vmatprep.subr.bf16.mxu0 %v2640_v4 }
 0x5ea   : > { %2422 = vmatpush3.bf16.msra.mxu0 %v2579_v41  ;;  %v2585_v41 = vld [vmem:[%s2808_s29 + $0x18] sm:$0xff]  }
 0x5eb   : > { %2435 = vmatprep.subr.bf16.mxu0 %v2640_v4 }
 0x6b8   : > { %v2418_v42 = vpop.f32.mrb[4].mxu0 }
 0x6b9   : > { %v1613_v43 = vpop.f32.mrb[5].mxu0 }
 0x6ba   : > { %v2571_v44 = vpack.i.bf16 %v2418_v42, %v1613_v43  ;;  %v2281_v42 = vld [vmem:[%s720_s25] ss:$0 sm:$0xff] }
 0x6bc   : > { %2572 = vrot.lane.b32.xlu0 %v2571_v44, %s2655_s1  ;;  %s3100_s1 = sld [smem:[#allocation12_spill]] (!%p2293_p5) }
 0x72e   : > { %v2573_v16 = vpop.permute.xlu0 %2572 }
 0x72f   : > { %v2575_v52 = vunpack.i.h.bf16 %v2573_v16  ;;  %v2574_v53 = vunpack.i.l.bf16 %v2573_v16 }
 0x731   : > { %v1651_v56 = vsel %vm1650_vm6, %v1648_v54, %v2574_v53  ;;  %v1652_v57 = vsel %vm1650_vm6, %v1649_v55, %v2575_v52 }
 0x732   : > { %v1657_v58 = vpack.c.bf16 %v1652_v57, %v1651_v56 }
 0x734   : > { %2424 = vmatmul.mubr.msk.bf16.vlgmr.msra.gmra.mrb[8].mxu0 %vm771_vm2, %v1657_v58 }
 0x735   : > { %2443 = vmatprep.mubr.msk.bf16.mxu0 %vm2641_vm1, %v2640_v4  ;;  %2436 = vmatpush3.bf16.msra.mxu0 %v2582_v21 }
 0x736   : > { %2437 = vmatprep.subr.bf16.mxu0 %v2640_v4 }
 0x739   : > { %2438 = vmatpush3.bf16.msra.mxu0 %v2583_v22 }
 0x73a   : > { %2439 = vmatprep.subr.bf16.mxu0 %v2640_v4 }
 0x73d   : > { %2440 = vmatpush3.bf16.msra.mxu0 %v2584_v17 }
 0x73e   : > { %2441 = vmatprep.subr.bf16.mxu0 %v2640_v4  ;;  %v2285_v4 = vld [vmem:[%s728_s14] ss:$0 sm:$0xff] }
 0x741   : > { %2442 = vmatpush3.bf16.msra.mxu0 %v2585_v41 }
 0x807   : > { %v1714_v60 = vpop.f32.mrb[8].mxu0 }
 0x808   : > { %v1715_v61 = vadd.f32 %v2275_v59, %v1714_v60  ;;  %v2425_v62 = vpop.f32.mrb[9].mxu0 }
 0x809   : > { %v1717_v63 = vpop.f32.mrb[10].mxu0 }
 0x80a   : > { %v1718_v0 = vadd.f32 %v2275_v59, %v1717_v63  ;;  %v2426_v1 = vpop.f32.mrb[11].mxu0  ;;  %v1721_v2 = vadd.f32 %v1715_v61, %v2832_v6 }
 0x80c   : > { %v1725_v3 = vsel %vm771_vm2, %v1721_v2, 0.0  ;;  %v1722_v5 = vadd.f32 %v1718_v0, %v2834_v7 }
 0x80d   : > { %1726 = vadd.xlane.f32.xlu1 %v1725_v3 }
 0x80e   : > { %v1728_v8 = vsel %vm771_vm2, %v1722_v5, 0.0 }
 0x80f   : > { %1729 = vadd.xlane.f32.xlu0 %v1728_v8 }
 0x89a   : > { %v1727_v9 = vpop.xlane.xlu1 %1726 }
 0x89b   : > { %v1732_v24 = vmul.f32 0.03125, %v1727_v9 }
 0x89c   : > { %v1730_v10 = vpop.xlane.xlu0 %1729 }
 0x89d   : > { %v1734_v11 = vsub.f32 %v1721_v2, %v1732_v24  ;;  %v1733_v12 = vmul.f32 0.03125, %v1730_v10 }
 0x89f   : > { %v1735_v13 = vsub.f32 %v1722_v5, %v1733_v12  ;;  %v1736_v14 = vmul.f32 %v1734_v11, %v1734_v11 }
 0x8a1   : > { %v1738_v6 = vsel %vm771_vm2, %v1736_v14, 0.0  ;;  %v1737_v15 = vmul.f32 %v1735_v13, %v1735_v13 }
 0x8a2   : > { %1739 = vadd.xlane.f32.xlu0 %v1738_v6  ;;  %v2291_v6 = vld [vmem:[%s731_s20] ss:$0 sm:$0xff] }
 0x8a3   : > { %v1741_v7 = vsel %vm771_vm2, %v1737_v15, 0.0 }
 0x8a4   : > { %1742 = vadd.xlane.f32.xlu1 %v1741_v7 }
 0x92f   : > { %v1740_v23 = vpop.xlane.xlu0 %1739 }
 0x930   : > { %v1744_v25 = vmul.f32 0.03125, %v1740_v23 }
 0x931   : > { %v1743_v26 = vpop.xlane.xlu1 %1742 }
 0x932   : > { %v1746_v27 = vadd.f32 1e-05, %v1744_v25  ;;  %v1745_v28 = vmul.f32 0.03125, %v1743_v26 }
 0x934   : > { %2618 = vrsqrt.f32 %v1746_v27  ;;  %v1747_v36 = vadd.f32 1e-05, %v1745_v28 }
 0x936   : > { %2620 = vrsqrt.f32 %v1747_v36 }
 0x93e   : > { %v2619_v37 = vpop.eup %2618 }
 0x93f   : > { %v1750_v30 = vmul.f32 %v2619_v37, %v1734_v11 }
 0x940   : > { %v2621_v31 = vpop.eup %2620 }
 0x941   : > { %v1758_v32 = vmul.f32 %v2279_v29, %v1750_v30  ;;  %v1751_v33 = vmul.f32 %v2621_v31, %v1735_v13 }
 0x943   : > { %v1759_v35 = vmul.f32 %v2279_v29, %v1751_v33  ;;  %v1766_v38 = vadd.f32 %v2280_v34, %v1758_v32 }
 0x945   : > { %v1767_v39 = vadd.f32 %v2280_v34, %v1759_v35 }
 0x947   : > { %v1772_v40 = vpack.c.bf16 %v1767_v39, %v1766_v38 }
 0x949   : > { %2432 = vmatmul.mubr.msk.bf16.vlgmr.msra.gmra.mrb[16].mxu1 %vm771_vm2, %v1772_v40  ;;  %v2627_v40 = vld [vmem:[%s3097_s17 + $0x8] sm:$0xff] (!%p2293_p5)  }
 0xa1c   : > { %v1829_v43 = vpop.f32.mrb[16].mxu1 }
 0xa1d   : > { %v1830_v44 = vadd.f32 %v2281_v42, %v1829_v43  ;;  %v2433_v45 = vpop.f32.mrb[17].mxu1 }
 0xa1e   : > { %v1832_v18 = vpop.f32.mrb[18].mxu1 }
 0xa1f   : > { %v1833_v46 = vadd.f32 %v2281_v42, %v1832_v18  ;;  %v2434_v47 = vpop.f32.mrb[19].mxu1  ;;  %v1836_v48 = vmax.f32 %v1830_v44, 0.0 }
 0xa21   : > { %v1837_v49 = vmax.f32 %v1833_v46, 0.0 }
 0xa23   : > { %v1846_v16 = vpack.c.bf16 %v1837_v49, %v1836_v48 }
 0xa25   : > { %2444 = vmatmul.mubr.msk.bf16.vlgmr.msra.gmra.mrb[12].mxu0 %vm1878_vm7, %v1846_v16  ;;  %v2294_v16 = vld [vmem:[%s3098_s19] ss:$0 sm:$0xff] (!%p2293_p5) }
 0xaf8   : > { %v1916_v50 = vpop.f32.mrb[12].mxu0 }
 0xaf9   : > { %v1917_v51 = vadd.f32 %v2285_v4, %v1916_v50  ;;  %v2445_v52 = vpop.f32.mrb[13].mxu0 }
 0xafa   : > { %v1919_v53 = vpop.f32.mrb[14].mxu0 }
 0xafb   : > { %v1920_v54 = vadd.f32 %v2285_v4, %v1919_v53  ;;  %v2446_v55 = vpop.f32.mrb[15].mxu0  ;;  %v1923_v56 = vadd.f32 %v1917_v51, %v1766_v38  ;;  %v2626_v38 = vld [vmem:[%s3097_s17] sm:$0xff] (!%p2293_p5)  }
 0xafc   : > { %v2298_v53 = vld [vmem:[%s3099_s2] ss:$0 sm:$0xff] (!%p2293_p5) }
 0xafd   : > { %v1927_v57 = vsel %vm771_vm2, %v1923_v56, 0.0  ;;  %v1924_v58 = vadd.f32 %v1920_v54, %v1767_v39  ;;  %v2656_v39 = vmov (!%p2293_p5), 0.0  }
 0xafe   : > { %1928 = vadd.xlane.f32.xlu0 %v1927_v57  ;;  %2447 = vmatprep.subr.bf16.mxu0 (!%p2293_p5), %v2656_v39 }
 0xaff   : > { %v1930_v59 = vsel %vm771_vm2, %v1924_v58, 0.0  ;;  %2451 = vmatprep.mubr.msk.bf16.mxu0 (!%p2293_p5), %vm2657_vm8, %v2656_v39  ;;  %2448 = vmatpush3.bf16.msra.mxu0 (!%p2293_p5), %v2626_v38 }
 0xb00   : > { %1931 = vadd.xlane.f32.xlu1 %v1930_v59  ;;  %2449 = vmatprep.subr.bf16.mxu0 (!%p2293_p5), %v2656_v39 }
 0xb03   : > { %2450 = vmatpush3.bf16.msra.mxu0 (!%p2293_p5), %v2627_v40 }
 0xb8b   : > { %v1929_v60 = vpop.xlane.xlu0 %1928 }
 0xb8c   : > { %v1933_v61 = vmul.f32 0.03125, %v1929_v60 }
 0xb8d   : > { %v1932_v62 = vpop.xlane.xlu1 %1931 }
 0xb8e   : > { %v1935_v63 = vsub.f32 %v1923_v56, %v1933_v61  ;;  %v1934_v0 = vmul.f32 0.03125, %v1932_v62  ;;  %v2299_v62 = vld [vmem:[#allocation3] ss:$0 sm:$0xff] (!%p2293_p5) }
 0xb90   : > { %v1936_v1 = vsub.f32 %v1924_v58, %v1934_v0  ;;  %v1937_v2 = vmul.f32 %v1935_v63, %v1935_v63 }
 0xb92   : > { %v1939_v3 = vsel %vm771_vm2, %v1937_v2, 0.0  ;;  %v1938_v5 = vmul.f32 %v1936_v1, %v1936_v1 }
 0xb93   : > { %1940 = vadd.xlane.f32.xlu0 %v1939_v3 }
 0xb94   : > { %v1942_v8 = vsel %vm771_vm2, %v1938_v5, 0.0 }
 0xb95   : > { %1943 = vadd.xlane.f32.xlu1 %v1942_v8 }
 0xc20   : > { %v1941_v9 = vpop.xlane.xlu0 %1940 }
 0xc21   : > { %v1945_v24 = vmul.f32 0.03125, %v1941_v9 }
 0xc22   : > { %v1944_v10 = vpop.xlane.xlu1 %1943 }
 0xc23   : > { %v1947_v11 = vadd.f32 1e-05, %v1945_v24  ;;  %v1946_v12 = vmul.f32 0.03125, %v1944_v10 }
 0xc25   : > { %2622 = vrsqrt.f32 %v1947_v11  ;;  %v1948_v13 = vadd.f32 1e-05, %v1946_v12 }
 0xc27   : > { %2624 = vrsqrt.f32 %v1948_v13 }
 0xc2f   : > { %v2623_v14 = vpop.eup %2622 }
 0xc30   : > { %v1951_v15 = vmul.f32 %v2623_v14, %v1935_v63 }
 0xc31   : > { %v2625_v7 = vpop.eup %2624 }
 0xc32   : > { %v1959_v20 = vmul.f32 %v2291_v6, %v1951_v15  ;;  %v1952_v21 = vmul.f32 %v2625_v7, %v1936_v1  ;;  %1974 = sbr.rel (%p2293_p5) target bundleno = 3807 (0xedf), region = 100 }
 0xc34   : > { %v1967_v22 = vadd.f32 %v2292_v19, %v1959_v20  ;;  %v1960_v23 = vmul.f32 %v2291_v6, %v1952_v21 }
 0xc36   : > { %1969 = vst.msk [vmem:[#allocation2] sm:$0xff] %vm771_vm2, %v1967_v22  ;;  %v1968_v25 = vadd.f32 %v2292_v19, %v1960_v23  ;;  %v1975_v26 = vsel (!%p2293_p5), %vm771_vm2, %v1967_v22, 0.0 }
 0xc37   : > { %1976 = vadd.xlane.f32.xlu0 (!%p2293_p5), %v1975_v26 }
 0xc38   : > { %1970 = vst.msk [vmem:[#allocation2 + $0x8] sm:$0xff] %vm771_vm2, %v1968_v25  ;;  %v1978_v27 = vsel (!%p2293_p5), %vm771_vm2, %v1968_v25, 0.0 }
 0xc3b   : > { %1979 = vadd.xlane.f32.xlu0 %v1978_v27 }
 0xcc4   : > { %v1977_v28 = vpop.xlane.xlu0 %1976 }
 0xcc5   : > { %v1981_v36 = vmul.f32 0.03125, %v1977_v28 }
 0xcc7   : > { %v1983_v37 = vsub.f32 %v1967_v22, %v1981_v36 }
 0xcc8   : > { %v1980_v29 = vpop.xlane.xlu0 %1979 }
 0xcc9   : > { %v1982_v30 = vmul.f32 0.03125, %v1980_v29  ;;  %v1985_v31 = vmul.f32 %v1983_v37, %v1983_v37 }
 0xccb   : > { %v1984_v32 = vsub.f32 %v1968_v25, %v1982_v30  ;;  %v1987_v33 = vsel %vm771_vm2, %v1985_v31, 0.0 }
 0xccc   : > { %1988 = vadd.xlane.f32.xlu1 %v1987_v33 }
 0xccd   : > { %v1986_v34 = vmul.f32 %v1984_v32, %v1984_v32 }
 0xccf   : > { %v1990_v35 = vsel %vm771_vm2, %v1986_v34, 0.0 }
 0xcd0   : > { %1991 = vadd.xlane.f32.xlu1 %v1990_v35 }
 0xd59   : > { %v1989_v17 = vpop.xlane.xlu1 %1988 }
 0xd5a   : > { %v1993_v41 = vmul.f32 0.03125, %v1989_v17 }
 0xd5c   : > { %v1995_v42 = vadd.f32 1e-06, %v1993_v41 }
 0xd5d   : > { %v1992_v43 = vpop.xlane.xlu1 %1991 }
 0xd5e   : > { %v1994_v44 = vmul.f32 0.03125, %v1992_v43  ;;  %2628 = vrsqrt.f32 %v1995_v42 }
 0xd60   : > { %v1996_v45 = vadd.f32 1e-06, %v1994_v44 }
 0xd62   : > { %2630 = vrsqrt.f32 %v1996_v45 }
 0xd68   : > { %v2629_v18 = vpop.eup %2628 }
 0xd69   : > { %v1999_v47 = vmul.f32 %v2629_v18, %v1983_v37 }
 0xd6c   : > { %v2631_v46 = vpop.eup %2630 }
 0xd6d   : > { %v2000_v48 = vmul.f32 %v2631_v46, %v1984_v32 }
 0xd6f   : > { %v2001_v49 = vpack.c.bf16 %v2000_v48, %v1999_v47 }
 0xd71   : > { %2452 = vmatmul.mubr.msk.bf16.vlgmr.msra.gmra.mrb[0].mxu0 %vm771_vm2, %v2001_v49 }
 0xe44   : > { %v2062_v4 = vpop.f32.mrb[0].mxu0 }
 0xe45   : > { %v2063_v50 = vadd.f32 %v2294_v16, %v2062_v4  ;;  %v2453_v51 = vpop.f32.mrb[1].mxu0 }
 0xe46   : > { %v2065_v52 = vpop.f32.mrb[2].mxu0 }
 0xe47   : > { %v2069_v54 = vmax.f32 %v2063_v50, 0.0  ;;  %v2066_v55 = vadd.f32 %v2294_v16, %v2065_v52  ;;  %v2454_v56 = vpop.f32.mrb[3].mxu0 }
 0xe49   : > { %v2070_v57 = vmax.f32 %v2066_v55, 0.0  ;;  %v2078_v58 = vmul.f32 %v2298_v53, %v2069_v54 }
 0xe4b   : > { %v2080_v59 = vsel %vm1878_vm7, %v2078_v58, 0.0  ;;  %v2079_v60 = vmul.f32 %v2298_v53, %v2070_v57 }
 0xe4c   : > { %2081 = vadd.xlane.f32.xlu0 %v2080_v59 }
 0xe4d   : > { %v2083_v61 = vsel %vm1878_vm7, %v2079_v60, 0.0 }
 0xe4e   : > { %2084 = vadd.xlane.f32.xlu1 %v2083_v61 }
 0xed9   : > { %v2082_v63 = vpop.xlane.xlu0 %2081 }
 0xeda   : > { %v2093_v0 = vadd.f32 %v2299_v62, %v2082_v63 }
 0xedb   : > { %v2085_v1 = vpop.xlane.xlu1 %2084 }
 0xedc   : > { %2096 = vst.msk [vmem:[%s3100_s1] sm:$0xff] %vm2095_vm9, %v2093_v0  ;;  %v2094_v2 = vadd.f32 %v2299_v62, %v2085_v1 }
 0xede   : > { %2097 = vst.msk [vmem:[%s3100_s1 + $0x8] sm:$0xff] %vm2095_vm9, %v2094_v2 }
 0xedf PF: > { %s3101_s14 = sld [smem:[#allocation4_spill]] }
 0xee5   : > { %s30_s29 = sadd.s32 1, %s3101_s14  }
 0xee6   : > { %p27_p6 = scmp.ge.s32.totalorder %s30_s29, 4  }
 0xee8   :  { %29 = sbr.rel (!%p27_p6) target bundleno = 9 (0x9), region = 159 }

</bundles_post_ra>
